<compile_context>
chip_gen: v6e
topology: v6e:2x2x1
jax: 0.10.0
libtpu: 0.0.40
codegen_flags: <defaults>
</compile_context>

<pallas_src>
import functools

import jax
import jax.numpy as jnp
from jax.experimental import pallas as pl
from jax.experimental.pallas import tpu as pltpu


def _gelu(v):
    # exact GELU (PyTorch nn.GELU default, approximate='none').
    # TODO(synk): switch to tanh-approx GELU (EUP tanh, frees VALU) if the caller
    # can tolerate ~1e-3 deviation from the erf-based reference.
    return 0.5 * v * (1.0 + jax.lax.erf(v * 0.7071067811865476))


def _conv_w(vm1, v0, vp1, taps):
    """Kernel-3 conv along W.

    vm1/v0/vp1: (C, L) pre-shifted + boundary-masked neighbour arrays.
    taps:       (3, Cout, C) effective taps; tap 0 pairs with w-1, 2 with w+1.
    """
    cin = v0.shape[0]
    cout = taps.shape[1]
    if cout >= 32 and cin >= 8 and v0.shape[1] >= 128:
        # MXU path for realistic channel counts: one K=3*C contraction, f32 acc.
        # Inputs kept f32 (multi-pass MXU matmul) to preserve numerics; cast to
        # bf16 here if the tolerance budget allows halving the MXU passes.
        slab = jnp.concatenate([vm1, v0, vp1], axis=0)                  # (3*C, L)
        taps2d = jnp.concatenate([taps[0], taps[1], taps[2]], axis=1)   # (Cout, 3*C)
        return jnp.dot(taps2d, slab, preferred_element_type=jnp.float32)
    # VPU broadcast-FMA path: cheapest when K = 3*C is tiny (as in the test below).
    acc = None
    for k, vk in enumerate((vm1, v0, vp1)):
        for ci in range(cin):
            term = taps[k, :, ci:ci + 1] * vk[ci:ci + 1, :]
            acc = term if acc is None else acc + term
    return acc


def _kernel(x_ref, wt_ref, bt_ref, w2_ref, b2_ref, out_ref, *, D, H, W):
    # x_ref : (1, Cin, S)     one sample; channels on sublanes, S = D*H*W on lanes
    # wt_ref: (3, Cout, Cin)  flipped ConvTranspose taps  wt_eff[k,co,ci] = wt[ci,co,2-k]
    # bt_ref: (Cout, 1)
    # w2_ref: (3, Cout, Cout) Conv3d taps                 w2_eff[k,co,ci] = w2[co,ci,k]
    # b2_ref: (Cout, 1)
    # out_ref:(1, Cout, 4*S) == (Cout, 2D, 2H, W) flattened over spatial (lane-dense)
    Cout = out_ref.shape[1]
    S = D * H * W
    S2 = 4 * S
    HW = H * W
    eps = 1e-5
    inv_s2 = 1.0 / S2

    x = x_ref[0]                        # (Cin, S)
    wt = wt_ref[...]                    # (3, Cout, Cin)
    w2 = w2_ref[...]                    # (3, Cout, Cout)
    bt = bt_ref[...]                    # (Cout, 1)
    b2 = b2_ref[...]

    # period-W boundary masks, generated in-kernel (no HBM traffic, no VMEM block).
    w_pos = jax.lax.broadcasted_iota(jnp.int32, (1, S), 1) % W
    m_l = (w_pos != 0).astype(jnp.float32)          # 1.0 where w != 0
    m_r = (w_pos != (W - 1)).astype(jnp.float32)    # 1.0 where w != W-1
    m_lw = m_l[:, 0:W]
    m_rw = m_r[:, 0:W]

    # W-direction neighbour taps: XLU lane-rotations + boundary masks. The columns
    # that wrap across row boundaries land exactly on w==0 / w==W-1 and are zeroed.
    def shift_prev(v):   # value at w-1
        return pltpu.roll(v, shift=1, axis=1) * m_l

    def shift_next(v):   # value at w+1
        return pltpu.roll(v, shift=v.shape[1] - 1, axis=1) * m_r

    # ---- 1) ConvTranspose3d: W-direction taps on the compact (pre-upsample) grid
    core = _conv_w(shift_prev(x), x, shift_next(x), wt)       # (Cout, S); bias below

    # ---- 2) InstanceNorm + GELU, analytic over the (2,2,1) zero-interleaved upsample.
    # y0 = upsample(core) + bt : core values at 1/4 of the S2 positions, plain bias
    # at the other 3/4 (including the output_padding rows).
    mean0 = jnp.sum(core, axis=1, keepdims=True) * inv_s2 + bt
    dc = core + (bt - mean0)                                  # centered core values
    d0 = bt - mean0                                           # centered "zero" positions
    var0 = (jnp.sum(dc * dc, axis=1, keepdims=True) + (3.0 * S) * (d0 * d0)) * inv_s2
    rstd0 = jax.lax.rsqrt(var0 + eps)
    z_core = _gelu(dc * rstd0)          # (Cout, S) residual / conv2 input on core rows
    z_c = _gelu(d0 * rstd0)             # (Cout, 1) value on every constant row

    # ---- 3) ResidualUnit conv (1,1,3), pad (0,0,1) along W
    y1_core = _conv_w(shift_prev(z_core), z_core, shift_next(z_core), w2) + b2

    # every "constant" row (odd d2 or odd h2) is the same W-length row
    zc_row = jnp.broadcast_to(z_c, (Cout, W))
    y1_crow = _conv_w(zc_row * m_lw, zc_row, zc_row * m_rw, w2) + b2     # (Cout, W)

    # ---- 4) InstanceNorm #2 statistics, exact over all S2 positions
    n_crows = 3.0 * D * H                                     # number of constant rows
    mean2 = (jnp.sum(y1_core, axis=1, keepdims=True)
             + n_crows * jnp.sum(y1_crow, axis=1, keepdims=True)) * inv_s2
    e_core = y1_core - mean2
    e_crow = y1_crow - mean2
    var2 = (jnp.sum(e_core * e_core, axis=1, keepdims=True)
            + n_crows * jnp.sum(e_crow * e_crow, axis=1, keepdims=True)) * inv_s2
    rstd2 = jax.lax.rsqrt(var2 + eps)

    # GELU + identity residual
    out_core = _gelu(e_core * rstd2) + z_core                 # (Cout, S)
    out_crow = _gelu(e_crow * rstd2) + z_c                    # (Cout, W) constant row

    # ---- output assembly: one wide, lane-dense store per input-d slab -----------
    # rows for d2 = 2d are the h-interleave (core, const, core, const, ...); rows
    # for d2 = 2d+1 are all the constant row. Each slab is (Cout, 4*H*W) and the
    # store offset d*4*H*W is static, so stores are wide and unmasked whenever
    # 4*H*W is a multiple of 128 (it is at the tested shape).
    crow_odd = jnp.concatenate([out_crow] * (2 * H), axis=1)  # (Cout, 2*H*W)
    for d in range(D):
        pieces = []
        for h in range(H):
            s0 = (d * H + h) * W
            pieces.append(out_core[:, s0:s0 + W])             # h2 = 2h   (core row)
            pieces.append(out_crow)                           # h2 = 2h+1 (constant)
        pieces.append(crow_odd)                               # d2 = 2d+1 (all constant)
        slab = jnp.concatenate(pieces, axis=1)                # (Cout, 4*H*W)
        o0 = d * 4 * HW
        out_ref[0, :, o0:o0 + 4 * HW] = slab
    # TODO(synk): for large D switch this Python unroll to a lax.fori_loop over d
    # (dynamic pl.ds offsets + pl.multiple_of), and add a spatial grid axis with a
    # two-pass InstanceNorm so realistic MONAI shapes fit v7x's 64 MiB VMEM and
    # feed both of its TensorCores when N is small/odd.


def _vmem_limit_bytes():
    # Leave headroom below physical VMEM: ~7/8 of capacity (~56 MiB on v7x,
    # ~112 MiB on v5e/v6e). Fall back to a conservative 64 MiB if the query fails.
    try:
        cap = pltpu.get_tpu_info().vmem_capacity_bytes
        return int(cap // 8 * 7)
    except Exception:
        return 64 * 1024 * 1024


def conv3d_up(x_ncdhw, wt, bt, w2, b2):
    """x_ncdhw: (N, Cin, D, H, W). Returns (N, Cout, 2D, 2H, W), float32."""
    N, Cin, D, H, W = x_ncdhw.shape
    assert W >= 2, "kernel-3 conv along W assumes W >= 2"
    Cout = wt.shape[1]
    S = D * H * W
    S2 = 4 * S

    # free reshape only (merge of trailing contiguous dims): no transpose, no pad.
    # TODO(synk): bf16 HBM residency for x / out would halve traffic once the conv
    # is on the MXU, if the consumer tolerates bf16 rounding (the 1e-3 check doesn't).
    x2 = x_ncdhw.reshape(N, Cin, S).astype(jnp.float32)

    # flipped ConvTranspose taps:   wt_eff[k, co, ci] = wt[ci, co, 0, 0, 2-k]
    wt_eff = jnp.transpose(wt[:, :, 0, 0, ::-1], (2, 1, 0)).astype(jnp.float32)
    # Conv3d (cross-correlation):   w2_eff[k, co, ci] = w2[co, ci, 0, 0, k]
    w2_eff = jnp.transpose(w2[:, :, 0, 0, :], (2, 0, 1)).astype(jnp.float32)
    bt_c = bt.reshape(Cout, 1).astype(jnp.float32)
    b2_c = b2.reshape(Cout, 1).astype(jnp.float32)

    kern = functools.partial(_kernel, D=D, H=H, W=W)
    out = pl.pallas_call(
        kern,
        out_shape=jax.ShapeDtypeStruct((N, Cout, S2), jnp.float32),
        grid_spec=pltpu.PrefetchScalarGridSpec(
            num_scalar_prefetch=0,
            grid=(N,),
            in_specs=[
                pl.BlockSpec((1, Cin, S), lambda n: (n, 0, 0)),
                pl.BlockSpec((3, Cout, Cin), lambda n: (0, 0, 0)),
                pl.BlockSpec((Cout, 1), lambda n: (0, 0)),
                pl.BlockSpec((3, Cout, Cout), lambda n: (0, 0, 0)),
                pl.BlockSpec((Cout, 1), lambda n: (0, 0)),
            ],
            out_specs=pl.BlockSpec((1, Cout, S2), lambda n: (n, 0, 0)),
        ),
        compiler_params=pltpu.CompilerParams(
            dimension_semantics=("parallel",),
            vmem_limit_bytes=_vmem_limit_bytes(),
        ),
    )(x2, wt_eff, bt_c, w2_eff, b2_c)

    # free reshape (split trailing dim) back to NCDHW
    return out.reshape(N, Cout, 2 * D, 2 * H, W)


def reference(x_ncdhw, wt, bt, w2, b2):
    """Pure-JAX reference mirroring the PyTorch module (NCDHW)."""
    dn = ('NCDHW', 'OIDHW', 'NCDHW')
    hp = jax.lax.Precision.HIGHEST
    # ConvTranspose3d == dilated conv with transposed+flipped kernel
    w_eq = jnp.flip(jnp.transpose(wt, (1, 0, 2, 3, 4)), axis=(2, 3, 4))
    y = jax.lax.conv_general_dilated(
        x_ncdhw, w_eq, window_strides=(1, 1, 1),
        padding=((0, 1), (0, 1), (1, 1)), lhs_dilation=(2, 2, 1),
        dimension_numbers=dn, precision=hp)
    y = y + bt.reshape(1, -1, 1, 1, 1)

    def inorm(v):
        mean = jnp.mean(v, axis=(2, 3, 4), keepdims=True)
        var = jnp.mean((v - mean) ** 2, axis=(2, 3, 4), keepdims=True)
        return (v - mean) / jnp.sqrt(var + 1e-5)

    g = lambda v: jax.nn.gelu(v, approximate=False)
    z = g(inorm(y))
    y2 = jax.lax.conv_general_dilated(
        z, w2, window_strides=(1, 1, 1),
        padding=((0, 0), (0, 0), (1, 1)), dimension_numbers=dn, precision=hp)
    y2 = y2 + b2.reshape(1, -1, 1, 1, 1)
    return g(inorm(y2)) + z


if __name__ == "__main__":
    key = jax.random.PRNGKey(0)
    k1, k2, k3, k4, k5 = jax.random.split(key, 5)
    N, Cin, Cout, D, H, W = 2, 4, 8, 4, 4, 8

    # deterministic synthetic parameters (shapes from the module's __init__)
    wt = jax.random.normal(k1, (Cin, Cout, 1, 1, 3), jnp.float32) * 0.1   # ConvTranspose3d weight
    bt = jax.random.normal(k2, (Cout,), jnp.float32) * 0.1                # ConvTranspose3d bias
    w2 = jax.random.normal(k3, (Cout, Cout, 1, 1, 3), jnp.float32) * 0.1  # Conv3d weight
    b2 = jax.random.normal(k4, (Cout,), jnp.float32) * 0.1                # Conv3d bias
    x = jax.random.normal(k5, (N, Cin, D, H, W), jnp.float32)

    out = jax.block_until_ready(conv3d_up(x, wt, bt, w2, b2))
    assert out.shape == (N, Cout, 2 * D, 2 * H, W), out.shape

    ref = jax.block_until_ready(reference(x, wt, bt, w2, b2))
    err = float(jnp.max(jnp.abs(out - ref)))
    assert err < 1e-3, f"max abs err {err}"

    print("KERNEL_OK")
</pallas_src>

<mosaic_0001>
module attributes {stable_mosaic.version = 11 : i64} {
  func.func @_kernel(%arg0: i32, %arg1: memref<1x4x128xf32, #tpu.memory_space<vmem>>, %arg2: memref<3x8x4xf32, #tpu.memory_space<vmem>>, %arg3: memref<8x1xf32, #tpu.memory_space<vmem>>, %arg4: memref<3x8x8xf32, #tpu.memory_space<vmem>>, %arg5: memref<8x1xf32, #tpu.memory_space<vmem>>, %arg6: memref<1x8x512xf32, #tpu.memory_space<vmem>>) attributes {dimension_semantics = [#tpu.dimension_semantics<parallel>], iteration_bounds = array<i64: 2>, scalar_prefetch = 0 : i64, scratch_operands = 0 : i64, tpu.core_type = #tpu.core_type<tc>, window_params = [{transform_indices = @transform_0, window_bounds = array<i64: 1, 4, 128>}, {pipeline_mode = #tpu.pipeline_mode<synchronous>, transform_indices = @transform_1, window_bounds = array<i64: 3, 8, 4>}, {pipeline_mode = #tpu.pipeline_mode<synchronous>, transform_indices = @transform_2, window_bounds = array<i64: 8, 1>}, {pipeline_mode = #tpu.pipeline_mode<synchronous>, transform_indices = @transform_3, window_bounds = array<i64: 3, 8, 8>}, {pipeline_mode = #tpu.pipeline_mode<synchronous>, transform_indices = @transform_4, window_bounds = array<i64: 8, 1>}, {transform_indices = @transform_5, window_bounds = array<i64: 1, 8, 512>}]} {
    %c0 = arith.constant 0 : index
    %c0_0 = arith.constant 0 : index
    %c0_1 = arith.constant 0 : index
    %0 = vector.load %arg1[%c0, %c0_0, %c0_1] : memref<1x4x128xf32, #tpu.memory_space<vmem>>, vector<1x4x128xf32>
    %1 = vector.shape_cast %0 : vector<1x4x128xf32> to vector<4x128xf32>
    %c0_2 = arith.constant 0 : index
    %c0_3 = arith.constant 0 : index
    %c0_4 = arith.constant 0 : index
    %2 = vector.load %arg2[%c0_2, %c0_3, %c0_4] : memref<3x8x4xf32, #tpu.memory_space<vmem>>, vector<3x8x4xf32>
    %c0_5 = arith.constant 0 : index
    %c0_6 = arith.constant 0 : index
    %c0_7 = arith.constant 0 : index
    %3 = vector.load %arg4[%c0_5, %c0_6, %c0_7] : memref<3x8x8xf32, #tpu.memory_space<vmem>>, vector<3x8x8xf32>
    %c0_8 = arith.constant 0 : index
    %c0_9 = arith.constant 0 : index
    %4 = vector.load %arg3[%c0_8, %c0_9] : memref<8x1xf32, #tpu.memory_space<vmem>>, vector<8x1xf32>
    %c0_10 = arith.constant 0 : index
    %c0_11 = arith.constant 0 : index
    %5 = vector.load %arg5[%c0_10, %c0_11] : memref<8x1xf32, #tpu.memory_space<vmem>>, vector<8x1xf32>
    %6 = tpu.iota {dimensions = array<i32: 1>} : vector<1x128xi32>
    %c8_i32 = arith.constant 8 : i32
    %c0_i32 = arith.constant 0 : i32
    %7 = arith.cmpi eq, %c8_i32, %c0_i32 : i32
    %c1_i32 = arith.constant 1 : i32
    %8 = arith.select %7, %c1_i32, %c8_i32 : i32
    %9 = vector.broadcast %8 : i32 to vector<1x128xi32>
    %10 = arith.remsi %6, %9 : vector<1x128xi32>
    %c0_i32_12 = arith.constant 0 : i32
    %11 = vector.broadcast %c0_i32_12 : i32 to vector<1x128xi32>
    %12 = arith.cmpi ne, %10, %11 : vector<1x128xi32>
    %c0_i32_13 = arith.constant 0 : i32
    %13 = vector.broadcast %c0_i32_13 : i32 to vector<1x128xi32>
    %14 = arith.cmpi slt, %10, %13 : vector<1x128xi32>
    %c0_i32_14 = arith.constant 0 : i32
    %15 = arith.cmpi slt, %8, %c0_i32_14 : i32
    %16 = vector.broadcast %15 : i1 to vector<1x128xi1>
    %17 = vector.broadcast %16 : vector<1x128xi1> to vector<1x128xi1>
    %18 = arith.xori %14, %17 : vector<1x128xi1>
    %19 = arith.andi %18, %12 : vector<1x128xi1>
    %20 = vector.broadcast %8 : i32 to vector<1x128xi32>
    %21 = arith.addi %10, %20 : vector<1x128xi32>
    %22 = arith.select %19, %21, %10 : vector<1x128xi1>, vector<1x128xi32>
    %c0_i32_15 = arith.constant 0 : i32
    %23 = vector.broadcast %c0_i32_15 : i32 to vector<1x128xi32>
    %24 = arith.cmpi ne, %22, %23 : vector<1x128xi32>
    %25 = arith.extui %24 : vector<1x128xi1> to vector<1x128xi32>
    %26 = arith.sitofp %25 : vector<1x128xi32> to vector<1x128xf32>
    %c7_i32 = arith.constant 7 : i32
    %27 = vector.broadcast %c7_i32 : i32 to vector<1x128xi32>
    %28 = arith.cmpi ne, %22, %27 : vector<1x128xi32>
    %29 = arith.extui %28 : vector<1x128xi1> to vector<1x128xi32>
    %30 = arith.sitofp %29 : vector<1x128xi32> to vector<1x128xf32>
    %31 = vector.extract_strided_slice %26 {offsets = [0, 0], sizes = [1, 8], strides = [1, 1]} : vector<1x128xf32> to vector<1x8xf32>
    %32 = vector.extract_strided_slice %30 {offsets = [0, 0], sizes = [1, 8], strides = [1, 1]} : vector<1x128xf32> to vector<1x8xf32>
    %c1_i32_16 = arith.constant 1 : i32
    %33 = tpu.dynamic_rotate %1 by %c1_i32_16 dim 1 : vector<4x128xf32>, i32 -> vector<4x128xf32>
    %34 = vector.broadcast %26 : vector<1x128xf32> to vector<4x128xf32>
    %35 = arith.mulf %33, %34 : vector<4x128xf32>
    %c127_i32 = arith.constant 127 : i32
    %36 = tpu.dynamic_rotate %1 by %c127_i32 dim 1 : vector<4x128xf32>, i32 -> vector<4x128xf32>
    %37 = vector.broadcast %30 : vector<1x128xf32> to vector<4x128xf32>
    %38 = arith.mulf %36, %37 : vector<4x128xf32>
    %39 = vector.extract_strided_slice %2 {offsets = [0, 0, 0], sizes = [1, 8, 1], strides = [1, 1, 1]} : vector<3x8x4xf32> to vector<1x8x1xf32>
    %40 = vector.shape_cast %39 : vector<1x8x1xf32> to vector<8x1xf32>
    %41 = vector.extract_strided_slice %35 {offsets = [0, 0], sizes = [1, 128], strides = [1, 1]} : vector<4x128xf32> to vector<1x128xf32>
    %42 = vector.broadcast %40 : vector<8x1xf32> to vector<8x128xf32>
    %43 = vector.broadcast %41 : vector<1x128xf32> to vector<8x128xf32>
    %44 = arith.mulf %42, %43 : vector<8x128xf32>
    %45 = vector.extract_strided_slice %2 {offsets = [0, 0, 1], sizes = [1, 8, 1], strides = [1, 1, 1]} : vector<3x8x4xf32> to vector<1x8x1xf32>
    %46 = vector.shape_cast %45 : vector<1x8x1xf32> to vector<8x1xf32>
    %47 = vector.extract_strided_slice %35 {offsets = [1, 0], sizes = [1, 128], strides = [1, 1]} : vector<4x128xf32> to vector<1x128xf32>
    %48 = vector.broadcast %46 : vector<8x1xf32> to vector<8x128xf32>
    %49 = vector.broadcast %47 : vector<1x128xf32> to vector<8x128xf32>
    %50 = arith.mulf %48, %49 : vector<8x128xf32>
    %51 = arith.addf %44, %50 : vector<8x128xf32>
    %52 = vector.extract_strided_slice %2 {offsets = [0, 0, 2], sizes = [1, 8, 1], strides = [1, 1, 1]} : vector<3x8x4xf32> to vector<1x8x1xf32>
    %53 = vector.shape_cast %52 : vector<1x8x1xf32> to vector<8x1xf32>
    %54 = vector.extract_strided_slice %35 {offsets = [2, 0], sizes = [1, 128], strides = [1, 1]} : vector<4x128xf32> to vector<1x128xf32>
    %55 = vector.broadcast %53 : vector<8x1xf32> to vector<8x128xf32>
    %56 = vector.broadcast %54 : vector<1x128xf32> to vector<8x128xf32>
    %57 = arith.mulf %55, %56 : vector<8x128xf32>
    %58 = arith.addf %51, %57 : vector<8x128xf32>
    %59 = vector.extract_strided_slice %2 {offsets = [0, 0, 3], sizes = [1, 8, 1], strides = [1, 1, 1]} : vector<3x8x4xf32> to vector<1x8x1xf32>
    %60 = vector.shape_cast %59 : vector<1x8x1xf32> to vector<8x1xf32>
    %61 = vector.extract_strided_slice %35 {offsets = [3, 0], sizes = [1, 128], strides = [1, 1]} : vector<4x128xf32> to vector<1x128xf32>
    %62 = vector.broadcast %60 : vector<8x1xf32> to vector<8x128xf32>
    %63 = vector.broadcast %61 : vector<1x128xf32> to vector<8x128xf32>
    %64 = arith.mulf %62, %63 : vector<8x128xf32>
    %65 = arith.addf %58, %64 : vector<8x128xf32>
    %66 = vector.extract_strided_slice %2 {offsets = [1, 0, 0], sizes = [1, 8, 1], strides = [1, 1, 1]} : vector<3x8x4xf32> to vector<1x8x1xf32>
    %67 = vector.shape_cast %66 : vector<1x8x1xf32> to vector<8x1xf32>
    %68 = vector.extract_strided_slice %1 {offsets = [0, 0], sizes = [1, 128], strides = [1, 1]} : vector<4x128xf32> to vector<1x128xf32>
    %69 = vector.broadcast %67 : vector<8x1xf32> to vector<8x128xf32>
    %70 = vector.broadcast %68 : vector<1x128xf32> to vector<8x128xf32>
    %71 = arith.mulf %69, %70 : vector<8x128xf32>
    %72 = arith.addf %65, %71 : vector<8x128xf32>
    %73 = vector.extract_strided_slice %2 {offsets = [1, 0, 1], sizes = [1, 8, 1], strides = [1, 1, 1]} : vector<3x8x4xf32> to vector<1x8x1xf32>
    %74 = vector.shape_cast %73 : vector<1x8x1xf32> to vector<8x1xf32>
    %75 = vector.extract_strided_slice %1 {offsets = [1, 0], sizes = [1, 128], strides = [1, 1]} : vector<4x128xf32> to vector<1x128xf32>
    %76 = vector.broadcast %74 : vector<8x1xf32> to vector<8x128xf32>
    %77 = vector.broadcast %75 : vector<1x128xf32> to vector<8x128xf32>
    %78 = arith.mulf %76, %77 : vector<8x128xf32>
    %79 = arith.addf %72, %78 : vector<8x128xf32>
    %80 = vector.extract_strided_slice %2 {offsets = [1, 0, 2], sizes = [1, 8, 1], strides = [1, 1, 1]} : vector<3x8x4xf32> to vector<1x8x1xf32>
    %81 = vector.shape_cast %80 : vector<1x8x1xf32> to vector<8x1xf32>
    %82 = vector.extract_strided_slice %1 {offsets = [2, 0], sizes = [1, 128], strides = [1, 1]} : vector<4x128xf32> to vector<1x128xf32>
    %83 = vector.broadcast %81 : vector<8x1xf32> to vector<8x128xf32>
    %84 = vector.broadcast %82 : vector<1x128xf32> to vector<8x128xf32>
    %85 = arith.mulf %83, %84 : vector<8x128xf32>
    %86 = arith.addf %79, %85 : vector<8x128xf32>
    %87 = vector.extract_strided_slice %2 {offsets = [1, 0, 3], sizes = [1, 8, 1], strides = [1, 1, 1]} : vector<3x8x4xf32> to vector<1x8x1xf32>
    %88 = vector.shape_cast %87 : vector<1x8x1xf32> to vector<8x1xf32>
    %89 = vector.extract_strided_slice %1 {offsets = [3, 0], sizes = [1, 128], strides = [1, 1]} : vector<4x128xf32> to vector<1x128xf32>
    %90 = vector.broadcast %88 : vector<8x1xf32> to vector<8x128xf32>
    %91 = vector.broadcast %89 : vector<1x128xf32> to vector<8x128xf32>
    %92 = arith.mulf %90, %91 : vector<8x128xf32>
    %93 = arith.addf %86, %92 : vector<8x128xf32>
    %94 = vector.extract_strided_slice %2 {offsets = [2, 0, 0], sizes = [1, 8, 1], strides = [1, 1, 1]} : vector<3x8x4xf32> to vector<1x8x1xf32>
    %95 = vector.shape_cast %94 : vector<1x8x1xf32> to vector<8x1xf32>
    %96 = vector.extract_strided_slice %38 {offsets = [0, 0], sizes = [1, 128], strides = [1, 1]} : vector<4x128xf32> to vector<1x128xf32>
    %97 = vector.broadcast %95 : vector<8x1xf32> to vector<8x128xf32>
    %98 = vector.broadcast %96 : vector<1x128xf32> to vector<8x128xf32>
    %99 = arith.mulf %97, %98 : vector<8x128xf32>
    %100 = arith.addf %93, %99 : vector<8x128xf32>
    %101 = vector.extract_strided_slice %2 {offsets = [2, 0, 1], sizes = [1, 8, 1], strides = [1, 1, 1]} : vector<3x8x4xf32> to vector<1x8x1xf32>
    %102 = vector.shape_cast %101 : vector<1x8x1xf32> to vector<8x1xf32>
    %103 = vector.extract_strided_slice %38 {offsets = [1, 0], sizes = [1, 128], strides = [1, 1]} : vector<4x128xf32> to vector<1x128xf32>
    %104 = vector.broadcast %102 : vector<8x1xf32> to vector<8x128xf32>
    %105 = vector.broadcast %103 : vector<1x128xf32> to vector<8x128xf32>
    %106 = arith.mulf %104, %105 : vector<8x128xf32>
    %107 = arith.addf %100, %106 : vector<8x128xf32>
    %108 = vector.extract_strided_slice %2 {offsets = [2, 0, 2], sizes = [1, 8, 1], strides = [1, 1, 1]} : vector<3x8x4xf32> to vector<1x8x1xf32>
    %109 = vector.shape_cast %108 : vector<1x8x1xf32> to vector<8x1xf32>
    %110 = vector.extract_strided_slice %38 {offsets = [2, 0], sizes = [1, 128], strides = [1, 1]} : vector<4x128xf32> to vector<1x128xf32>
    %111 = vector.broadcast %109 : vector<8x1xf32> to vector<8x128xf32>
    %112 = vector.broadcast %110 : vector<1x128xf32> to vector<8x128xf32>
    %113 = arith.mulf %111, %112 : vector<8x128xf32>
    %114 = arith.addf %107, %113 : vector<8x128xf32>
    %115 = vector.extract_strided_slice %2 {offsets = [2, 0, 3], sizes = [1, 8, 1], strides = [1, 1, 1]} : vector<3x8x4xf32> to vector<1x8x1xf32>
    %116 = vector.shape_cast %115 : vector<1x8x1xf32> to vector<8x1xf32>
    %117 = vector.extract_strided_slice %38 {offsets = [3, 0], sizes = [1, 128], strides = [1, 1]} : vector<4x128xf32> to vector<1x128xf32>
    %118 = vector.broadcast %116 : vector<8x1xf32> to vector<8x128xf32>
    %119 = vector.broadcast %117 : vector<1x128xf32> to vector<8x128xf32>
    %120 = arith.mulf %118, %119 : vector<8x128xf32>
    %121 = arith.addf %114, %120 : vector<8x128xf32>
    %cst = arith.constant dense<0.000000e+00> : vector<8xf32>
    %122 = vector.multi_reduction <add>, %121, %cst [1] : vector<8x128xf32> to vector<8xf32>
    %123 = vector.shape_cast %122 : vector<8xf32> to vector<8x1xf32>
    %cst_17 = arith.constant 0.001953125 : f32
    %124 = vector.broadcast %cst_17 : f32 to vector<8x1xf32>
    %125 = arith.mulf %123, %124 : vector<8x1xf32>
    %126 = arith.addf %125, %4 : vector<8x1xf32>
    %127 = arith.subf %4, %126 : vector<8x1xf32>
    %128 = vector.broadcast %127 : vector<8x1xf32> to vector<8x128xf32>
    %129 = arith.addf %121, %128 : vector<8x128xf32>
    %130 = arith.subf %4, %126 : vector<8x1xf32>
    %131 = arith.mulf %129, %129 : vector<8x128xf32>
    %cst_18 = arith.constant dense<0.000000e+00> : vector<8xf32>
    %132 = vector.multi_reduction <add>, %131, %cst_18 [1] : vector<8x128xf32> to vector<8xf32>
    %133 = vector.shape_cast %132 : vector<8xf32> to vector<8x1xf32>
    %134 = arith.mulf %130, %130 : vector<8x1xf32>
    %cst_19 = arith.constant 3.840000e+02 : f32
    %135 = vector.broadcast %cst_19 : f32 to vector<8x1xf32>
    %136 = arith.mulf %135, %134 : vector<8x1xf32>
    %137 = arith.addf %133, %136 : vector<8x1xf32>
    %cst_20 = arith.constant 0.001953125 : f32
    %138 = vector.broadcast %cst_20 : f32 to vector<8x1xf32>
    %139 = arith.mulf %137, %138 : vector<8x1xf32>
    %cst_21 = arith.constant 9.99999974E-6 : f32
    %140 = vector.broadcast %cst_21 : f32 to vector<8x1xf32>
    %141 = arith.addf %139, %140 : vector<8x1xf32>
    %142 = math.rsqrt %141 : vector<8x1xf32>
    %143 = vector.broadcast %142 : vector<8x1xf32> to vector<8x128xf32>
    %144 = arith.mulf %129, %143 : vector<8x128xf32>
    %cst_22 = arith.constant 5.000000e-01 : f32
    %145 = vector.broadcast %cst_22 : f32 to vector<8x128xf32>
    %146 = arith.mulf %145, %144 : vector<8x128xf32>
    %cst_23 = arith.constant 0.707106769 : f32
    %147 = vector.broadcast %cst_23 : f32 to vector<8x128xf32>
    %148 = arith.mulf %144, %147 : vector<8x128xf32>
    %149 = math.erf %148 : vector<8x128xf32>
    %cst_24 = arith.constant 1.000000e+00 : f32
    %150 = vector.broadcast %cst_24 : f32 to vector<8x128xf32>
    %151 = arith.addf %150, %149 : vector<8x128xf32>
    %152 = arith.mulf %146, %151 : vector<8x128xf32>
    %153 = arith.mulf %130, %142 : vector<8x1xf32>
    %cst_25 = arith.constant 5.000000e-01 : f32
    %154 = vector.broadcast %cst_25 : f32 to vector<8x1xf32>
    %155 = arith.mulf %154, %153 : vector<8x1xf32>
    %cst_26 = arith.constant 0.707106769 : f32
    %156 = vector.broadcast %cst_26 : f32 to vector<8x1xf32>
    %157 = arith.mulf %153, %156 : vector<8x1xf32>
    %158 = math.erf %157 : vector<8x1xf32>
    %cst_27 = arith.constant 1.000000e+00 : f32
    %159 = vector.broadcast %cst_27 : f32 to vector<8x1xf32>
    %160 = arith.addf %159, %158 : vector<8x1xf32>
    %161 = arith.mulf %155, %160 : vector<8x1xf32>
    %c1_i32_28 = arith.constant 1 : i32
    %162 = tpu.dynamic_rotate %152 by %c1_i32_28 dim 1 : vector<8x128xf32>, i32 -> vector<8x128xf32>
    %163 = vector.broadcast %26 : vector<1x128xf32> to vector<8x128xf32>
    %164 = arith.mulf %162, %163 : vector<8x128xf32>
    %c127_i32_29 = arith.constant 127 : i32
    %165 = tpu.dynamic_rotate %152 by %c127_i32_29 dim 1 : vector<8x128xf32>, i32 -> vector<8x128xf32>
    %166 = vector.broadcast %30 : vector<1x128xf32> to vector<8x128xf32>
    %167 = arith.mulf %165, %166 : vector<8x128xf32>
    %168 = vector.extract_strided_slice %3 {offsets = [0, 0, 0], sizes = [1, 8, 1], strides = [1, 1, 1]} : vector<3x8x8xf32> to vector<1x8x1xf32>
    %169 = vector.shape_cast %168 : vector<1x8x1xf32> to vector<8x1xf32>
    %170 = vector.extract_strided_slice %164 {offsets = [0, 0], sizes = [1, 128], strides = [1, 1]} : vector<8x128xf32> to vector<1x128xf32>
    %171 = vector.broadcast %169 : vector<8x1xf32> to vector<8x128xf32>
    %172 = vector.broadcast %170 : vector<1x128xf32> to vector<8x128xf32>
    %173 = arith.mulf %171, %172 : vector<8x128xf32>
    %174 = vector.extract_strided_slice %3 {offsets = [0, 0, 1], sizes = [1, 8, 1], strides = [1, 1, 1]} : vector<3x8x8xf32> to vector<1x8x1xf32>
    %175 = vector.shape_cast %174 : vector<1x8x1xf32> to vector<8x1xf32>
    %176 = vector.extract_strided_slice %164 {offsets = [1, 0], sizes = [1, 128], strides = [1, 1]} : vector<8x128xf32> to vector<1x128xf32>
    %177 = vector.broadcast %175 : vector<8x1xf32> to vector<8x128xf32>
    %178 = vector.broadcast %176 : vector<1x128xf32> to vector<8x128xf32>
    %179 = arith.mulf %177, %178 : vector<8x128xf32>
    %180 = arith.addf %173, %179 : vector<8x128xf32>
    %181 = vector.extract_strided_slice %3 {offsets = [0, 0, 2], sizes = [1, 8, 1], strides = [1, 1, 1]} : vector<3x8x8xf32> to vector<1x8x1xf32>
    %182 = vector.shape_cast %181 : vector<1x8x1xf32> to vector<8x1xf32>
    %183 = vector.extract_strided_slice %164 {offsets = [2, 0], sizes = [1, 128], strides = [1, 1]} : vector<8x128xf32> to vector<1x128xf32>
    %184 = vector.broadcast %182 : vector<8x1xf32> to vector<8x128xf32>
    %185 = vector.broadcast %183 : vector<1x128xf32> to vector<8x128xf32>
    %186 = arith.mulf %184, %185 : vector<8x128xf32>
    %187 = arith.addf %180, %186 : vector<8x128xf32>
    %188 = vector.extract_strided_slice %3 {offsets = [0, 0, 3], sizes = [1, 8, 1], strides = [1, 1, 1]} : vector<3x8x8xf32> to vector<1x8x1xf32>
    %189 = vector.shape_cast %188 : vector<1x8x1xf32> to vector<8x1xf32>
    %190 = vector.extract_strided_slice %164 {offsets = [3, 0], sizes = [1, 128], strides = [1, 1]} : vector<8x128xf32> to vector<1x128xf32>
    %191 = vector.broadcast %189 : vector<8x1xf32> to vector<8x128xf32>
    %192 = vector.broadcast %190 : vector<1x128xf32> to vector<8x128xf32>
    %193 = arith.mulf %191, %192 : vector<8x128xf32>
    %194 = arith.addf %187, %193 : vector<8x128xf32>
    %195 = vector.extract_strided_slice %3 {offsets = [0, 0, 4], sizes = [1, 8, 1], strides = [1, 1, 1]} : vector<3x8x8xf32> to vector<1x8x1xf32>
    %196 = vector.shape_cast %195 : vector<1x8x1xf32> to vector<8x1xf32>
    %197 = vector.extract_strided_slice %164 {offsets = [4, 0], sizes = [1, 128], strides = [1, 1]} : vector<8x128xf32> to vector<1x128xf32>
    %198 = vector.broadcast %196 : vector<8x1xf32> to vector<8x128xf32>
    %199 = vector.broadcast %197 : vector<1x128xf32> to vector<8x128xf32>
    %200 = arith.mulf %198, %199 : vector<8x128xf32>
    %201 = arith.addf %194, %200 : vector<8x128xf32>
    %202 = vector.extract_strided_slice %3 {offsets = [0, 0, 5], sizes = [1, 8, 1], strides = [1, 1, 1]} : vector<3x8x8xf32> to vector<1x8x1xf32>
    %203 = vector.shape_cast %202 : vector<1x8x1xf32> to vector<8x1xf32>
    %204 = vector.extract_strided_slice %164 {offsets = [5, 0], sizes = [1, 128], strides = [1, 1]} : vector<8x128xf32> to vector<1x128xf32>
    %205 = vector.broadcast %203 : vector<8x1xf32> to vector<8x128xf32>
    %206 = vector.broadcast %204 : vector<1x128xf32> to vector<8x128xf32>
    %207 = arith.mulf %205, %206 : vector<8x128xf32>
    %208 = arith.addf %201, %207 : vector<8x128xf32>
    %209 = vector.extract_strided_slice %3 {offsets = [0, 0, 6], sizes = [1, 8, 1], strides = [1, 1, 1]} : vector<3x8x8xf32> to vector<1x8x1xf32>
    %210 = vector.shape_cast %209 : vector<1x8x1xf32> to vector<8x1xf32>
    %211 = vector.extract_strided_slice %164 {offsets = [6, 0], sizes = [1, 128], strides = [1, 1]} : vector<8x128xf32> to vector<1x128xf32>
    %212 = vector.broadcast %210 : vector<8x1xf32> to vector<8x128xf32>
    %213 = vector.broadcast %211 : vector<1x128xf32> to vector<8x128xf32>
    %214 = arith.mulf %212, %213 : vector<8x128xf32>
    %215 = arith.addf %208, %214 : vector<8x128xf32>
    %216 = vector.extract_strided_slice %3 {offsets = [0, 0, 7], sizes = [1, 8, 1], strides = [1, 1, 1]} : vector<3x8x8xf32> to vector<1x8x1xf32>
    %217 = vector.shape_cast %216 : vector<1x8x1xf32> to vector<8x1xf32>
    %218 = vector.extract_strided_slice %164 {offsets = [7, 0], sizes = [1, 128], strides = [1, 1]} : vector<8x128xf32> to vector<1x128xf32>
    %219 = vector.broadcast %217 : vector<8x1xf32> to vector<8x128xf32>
    %220 = vector.broadcast %218 : vector<1x128xf32> to vector<8x128xf32>
    %221 = arith.mulf %219, %220 : vector<8x128xf32>
    %222 = arith.addf %215, %221 : vector<8x128xf32>
    %223 = vector.extract_strided_slice %3 {offsets = [1, 0, 0], sizes = [1, 8, 1], strides = [1, 1, 1]} : vector<3x8x8xf32> to vector<1x8x1xf32>
    %224 = vector.shape_cast %223 : vector<1x8x1xf32> to vector<8x1xf32>
    %225 = vector.extract_strided_slice %152 {offsets = [0, 0], sizes = [1, 128], strides = [1, 1]} : vector<8x128xf32> to vector<1x128xf32>
    %226 = vector.broadcast %224 : vector<8x1xf32> to vector<8x128xf32>
    %227 = vector.broadcast %225 : vector<1x128xf32> to vector<8x128xf32>
    %228 = arith.mulf %226, %227 : vector<8x128xf32>
    %229 = arith.addf %222, %228 : vector<8x128xf32>
    %230 = vector.extract_strided_slice %3 {offsets = [1, 0, 1], sizes = [1, 8, 1], strides = [1, 1, 1]} : vector<3x8x8xf32> to vector<1x8x1xf32>
    %231 = vector.shape_cast %230 : vector<1x8x1xf32> to vector<8x1xf32>
    %232 = vector.extract_strided_slice %152 {offsets = [1, 0], sizes = [1, 128], strides = [1, 1]} : vector<8x128xf32> to vector<1x128xf32>
    %233 = vector.broadcast %231 : vector<8x1xf32> to vector<8x128xf32>
    %234 = vector.broadcast %232 : vector<1x128xf32> to vector<8x128xf32>
    %235 = arith.mulf %233, %234 : vector<8x128xf32>
    %236 = arith.addf %229, %235 : vector<8x128xf32>
    %237 = vector.extract_strided_slice %3 {offsets = [1, 0, 2], sizes = [1, 8, 1], strides = [1, 1, 1]} : vector<3x8x8xf32> to vector<1x8x1xf32>
    %238 = vector.shape_cast %237 : vector<1x8x1xf32> to vector<8x1xf32>
    %239 = vector.extract_strided_slice %152 {offsets = [2, 0], sizes = [1, 128], strides = [1, 1]} : vector<8x128xf32> to vector<1x128xf32>
    %240 = vector.broadcast %238 : vector<8x1xf32> to vector<8x128xf32>
    %241 = vector.broadcast %239 : vector<1x128xf32> to vector<8x128xf32>
    %242 = arith.mulf %240, %241 : vector<8x128xf32>
    %243 = arith.addf %236, %242 : vector<8x128xf32>
    %244 = vector.extract_strided_slice %3 {offsets = [1, 0, 3], sizes = [1, 8, 1], strides = [1, 1, 1]} : vector<3x8x8xf32> to vector<1x8x1xf32>
    %245 = vector.shape_cast %244 : vector<1x8x1xf32> to vector<8x1xf32>
    %246 = vector.extract_strided_slice %152 {offsets = [3, 0], sizes = [1, 128], strides = [1, 1]} : vector<8x128xf32> to vector<1x128xf32>
    %247 = vector.broadcast %245 : vector<8x1xf32> to vector<8x128xf32>
    %248 = vector.broadcast %246 : vector<1x128xf32> to vector<8x128xf32>
    %249 = arith.mulf %247, %248 : vector<8x128xf32>
    %250 = arith.addf %243, %249 : vector<8x128xf32>
    %251 = vector.extract_strided_slice %3 {offsets = [1, 0, 4], sizes = [1, 8, 1], strides = [1, 1, 1]} : vector<3x8x8xf32> to vector<1x8x1xf32>
    %252 = vector.shape_cast %251 : vector<1x8x1xf32> to vector<8x1xf32>
    %253 = vector.extract_strided_slice %152 {offsets = [4, 0], sizes = [1, 128], strides = [1, 1]} : vector<8x128xf32> to vector<1x128xf32>
    %254 = vector.broadcast %252 : vector<8x1xf32> to vector<8x128xf32>
    %255 = vector.broadcast %253 : vector<1x128xf32> to vector<8x128xf32>
    %256 = arith.mulf %254, %255 : vector<8x128xf32>
    %257 = arith.addf %250, %256 : vector<8x128xf32>
    %258 = vector.extract_strided_slice %3 {offsets = [1, 0, 5], sizes = [1, 8, 1], strides = [1, 1, 1]} : vector<3x8x8xf32> to vector<1x8x1xf32>
    %259 = vector.shape_cast %258 : vector<1x8x1xf32> to vector<8x1xf32>
    %260 = vector.extract_strided_slice %152 {offsets = [5, 0], sizes = [1, 128], strides = [1, 1]} : vector<8x128xf32> to vector<1x128xf32>
    %261 = vector.broadcast %259 : vector<8x1xf32> to vector<8x128xf32>
    %262 = vector.broadcast %260 : vector<1x128xf32> to vector<8x128xf32>
    %263 = arith.mulf %261, %262 : vector<8x128xf32>
    %264 = arith.addf %257, %263 : vector<8x128xf32>
    %265 = vector.extract_strided_slice %3 {offsets = [1, 0, 6], sizes = [1, 8, 1], strides = [1, 1, 1]} : vector<3x8x8xf32> to vector<1x8x1xf32>
    %266 = vector.shape_cast %265 : vector<1x8x1xf32> to vector<8x1xf32>
    %267 = vector.extract_strided_slice %152 {offsets = [6, 0], sizes = [1, 128], strides = [1, 1]} : vector<8x128xf32> to vector<1x128xf32>
    %268 = vector.broadcast %266 : vector<8x1xf32> to vector<8x128xf32>
    %269 = vector.broadcast %267 : vector<1x128xf32> to vector<8x128xf32>
    %270 = arith.mulf %268, %269 : vector<8x128xf32>
    %271 = arith.addf %264, %270 : vector<8x128xf32>
    %272 = vector.extract_strided_slice %3 {offsets = [1, 0, 7], sizes = [1, 8, 1], strides = [1, 1, 1]} : vector<3x8x8xf32> to vector<1x8x1xf32>
    %273 = vector.shape_cast %272 : vector<1x8x1xf32> to vector<8x1xf32>
    %274 = vector.extract_strided_slice %152 {offsets = [7, 0], sizes = [1, 128], strides = [1, 1]} : vector<8x128xf32> to vector<1x128xf32>
    %275 = vector.broadcast %273 : vector<8x1xf32> to vector<8x128xf32>
    %276 = vector.broadcast %274 : vector<1x128xf32> to vector<8x128xf32>
    %277 = arith.mulf %275, %276 : vector<8x128xf32>
    %278 = arith.addf %271, %277 : vector<8x128xf32>
    %279 = vector.extract_strided_slice %3 {offsets = [2, 0, 0], sizes = [1, 8, 1], strides = [1, 1, 1]} : vector<3x8x8xf32> to vector<1x8x1xf32>
    %280 = vector.shape_cast %279 : vector<1x8x1xf32> to vector<8x1xf32>
    %281 = vector.extract_strided_slice %167 {offsets = [0, 0], sizes = [1, 128], strides = [1, 1]} : vector<8x128xf32> to vector<1x128xf32>
    %282 = vector.broadcast %280 : vector<8x1xf32> to vector<8x128xf32>
    %283 = vector.broadcast %281 : vector<1x128xf32> to vector<8x128xf32>
    %284 = arith.mulf %282, %283 : vector<8x128xf32>
    %285 = arith.addf %278, %284 : vector<8x128xf32>
    %286 = vector.extract_strided_slice %3 {offsets = [2, 0, 1], sizes = [1, 8, 1], strides = [1, 1, 1]} : vector<3x8x8xf32> to vector<1x8x1xf32>
    %287 = vector.shape_cast %286 : vector<1x8x1xf32> to vector<8x1xf32>
    %288 = vector.extract_strided_slice %167 {offsets = [1, 0], sizes = [1, 128], strides = [1, 1]} : vector<8x128xf32> to vector<1x128xf32>
    %289 = vector.broadcast %287 : vector<8x1xf32> to vector<8x128xf32>
    %290 = vector.broadcast %288 : vector<1x128xf32> to vector<8x128xf32>
    %291 = arith.mulf %289, %290 : vector<8x128xf32>
    %292 = arith.addf %285, %291 : vector<8x128xf32>
    %293 = vector.extract_strided_slice %3 {offsets = [2, 0, 2], sizes = [1, 8, 1], strides = [1, 1, 1]} : vector<3x8x8xf32> to vector<1x8x1xf32>
    %294 = vector.shape_cast %293 : vector<1x8x1xf32> to vector<8x1xf32>
    %295 = vector.extract_strided_slice %167 {offsets = [2, 0], sizes = [1, 128], strides = [1, 1]} : vector<8x128xf32> to vector<1x128xf32>
    %296 = vector.broadcast %294 : vector<8x1xf32> to vector<8x128xf32>
    %297 = vector.broadcast %295 : vector<1x128xf32> to vector<8x128xf32>
    %298 = arith.mulf %296, %297 : vector<8x128xf32>
    %299 = arith.addf %292, %298 : vector<8x128xf32>
    %300 = vector.extract_strided_slice %3 {offsets = [2, 0, 3], sizes = [1, 8, 1], strides = [1, 1, 1]} : vector<3x8x8xf32> to vector<1x8x1xf32>
    %301 = vector.shape_cast %300 : vector<1x8x1xf32> to vector<8x1xf32>
    %302 = vector.extract_strided_slice %167 {offsets = [3, 0], sizes = [1, 128], strides = [1, 1]} : vector<8x128xf32> to vector<1x128xf32>
    %303 = vector.broadcast %301 : vector<8x1xf32> to vector<8x128xf32>
    %304 = vector.broadcast %302 : vector<1x128xf32> to vector<8x128xf32>
    %305 = arith.mulf %303, %304 : vector<8x128xf32>
    %306 = arith.addf %299, %305 : vector<8x128xf32>
    %307 = vector.extract_strided_slice %3 {offsets = [2, 0, 4], sizes = [1, 8, 1], strides = [1, 1, 1]} : vector<3x8x8xf32> to vector<1x8x1xf32>
    %308 = vector.shape_cast %307 : vector<1x8x1xf32> to vector<8x1xf32>
    %309 = vector.extract_strided_slice %167 {offsets = [4, 0], sizes = [1, 128], strides = [1, 1]} : vector<8x128xf32> to vector<1x128xf32>
    %310 = vector.broadcast %308 : vector<8x1xf32> to vector<8x128xf32>
    %311 = vector.broadcast %309 : vector<1x128xf32> to vector<8x128xf32>
    %312 = arith.mulf %310, %311 : vector<8x128xf32>
    %313 = arith.addf %306, %312 : vector<8x128xf32>
    %314 = vector.extract_strided_slice %3 {offsets = [2, 0, 5], sizes = [1, 8, 1], strides = [1, 1, 1]} : vector<3x8x8xf32> to vector<1x8x1xf32>
    %315 = vector.shape_cast %314 : vector<1x8x1xf32> to vector<8x1xf32>
    %316 = vector.extract_strided_slice %167 {offsets = [5, 0], sizes = [1, 128], strides = [1, 1]} : vector<8x128xf32> to vector<1x128xf32>
    %317 = vector.broadcast %315 : vector<8x1xf32> to vector<8x128xf32>
    %318 = vector.broadcast %316 : vector<1x128xf32> to vector<8x128xf32>
    %319 = arith.mulf %317, %318 : vector<8x128xf32>
    %320 = arith.addf %313, %319 : vector<8x128xf32>
    %321 = vector.extract_strided_slice %3 {offsets = [2, 0, 6], sizes = [1, 8, 1], strides = [1, 1, 1]} : vector<3x8x8xf32> to vector<1x8x1xf32>
    %322 = vector.shape_cast %321 : vector<1x8x1xf32> to vector<8x1xf32>
    %323 = vector.extract_strided_slice %167 {offsets = [6, 0], sizes = [1, 128], strides = [1, 1]} : vector<8x128xf32> to vector<1x128xf32>
    %324 = vector.broadcast %322 : vector<8x1xf32> to vector<8x128xf32>
    %325 = vector.broadcast %323 : vector<1x128xf32> to vector<8x128xf32>
    %326 = arith.mulf %324, %325 : vector<8x128xf32>
    %327 = arith.addf %320, %326 : vector<8x128xf32>
    %328 = vector.extract_strided_slice %3 {offsets = [2, 0, 7], sizes = [1, 8, 1], strides = [1, 1, 1]} : vector<3x8x8xf32> to vector<1x8x1xf32>
    %329 = vector.shape_cast %328 : vector<1x8x1xf32> to vector<8x1xf32>
    %330 = vector.extract_strided_slice %167 {offsets = [7, 0], sizes = [1, 128], strides = [1, 1]} : vector<8x128xf32> to vector<1x128xf32>
    %331 = vector.broadcast %329 : vector<8x1xf32> to vector<8x128xf32>
    %332 = vector.broadcast %330 : vector<1x128xf32> to vector<8x128xf32>
    %333 = arith.mulf %331, %332 : vector<8x128xf32>
    %334 = arith.addf %327, %333 : vector<8x128xf32>
    %335 = vector.broadcast %5 : vector<8x1xf32> to vector<8x128xf32>
    %336 = arith.addf %334, %335 : vector<8x128xf32>
    %337 = vector.shape_cast %161 : vector<8x1xf32> to vector<8x1xf32>
    %338 = vector.broadcast %337 : vector<8x1xf32> to vector<8x8xf32>
    %339 = vector.broadcast %31 : vector<1x8xf32> to vector<8x8xf32>
    %340 = arith.mulf %338, %339 : vector<8x8xf32>
    %341 = vector.broadcast %32 : vector<1x8xf32> to vector<8x8xf32>
    %342 = arith.mulf %338, %341 : vector<8x8xf32>
    %343 = vector.extract_strided_slice %3 {offsets = [0, 0, 0], sizes = [1, 8, 1], strides = [1, 1, 1]} : vector<3x8x8xf32> to vector<1x8x1xf32>
    %344 = vector.shape_cast %343 : vector<1x8x1xf32> to vector<8x1xf32>
    %345 = vector.extract_strided_slice %340 {offsets = [0, 0], sizes = [1, 8], strides = [1, 1]} : vector<8x8xf32> to vector<1x8xf32>
    %346 = vector.broadcast %344 : vector<8x1xf32> to vector<8x8xf32>
    %347 = vector.broadcast %345 : vector<1x8xf32> to vector<8x8xf32>
    %348 = arith.mulf %346, %347 : vector<8x8xf32>
    %349 = vector.extract_strided_slice %3 {offsets = [0, 0, 1], sizes = [1, 8, 1], strides = [1, 1, 1]} : vector<3x8x8xf32> to vector<1x8x1xf32>
    %350 = vector.shape_cast %349 : vector<1x8x1xf32> to vector<8x1xf32>
    %351 = vector.extract_strided_slice %340 {offsets = [1, 0], sizes = [1, 8], strides = [1, 1]} : vector<8x8xf32> to vector<1x8xf32>
    %352 = vector.broadcast %350 : vector<8x1xf32> to vector<8x8xf32>
    %353 = vector.broadcast %351 : vector<1x8xf32> to vector<8x8xf32>
    %354 = arith.mulf %352, %353 : vector<8x8xf32>
    %355 = arith.addf %348, %354 : vector<8x8xf32>
    %356 = vector.extract_strided_slice %3 {offsets = [0, 0, 2], sizes = [1, 8, 1], strides = [1, 1, 1]} : vector<3x8x8xf32> to vector<1x8x1xf32>
    %357 = vector.shape_cast %356 : vector<1x8x1xf32> to vector<8x1xf32>
    %358 = vector.extract_strided_slice %340 {offsets = [2, 0], sizes = [1, 8], strides = [1, 1]} : vector<8x8xf32> to vector<1x8xf32>
    %359 = vector.broadcast %357 : vector<8x1xf32> to vector<8x8xf32>
    %360 = vector.broadcast %358 : vector<1x8xf32> to vector<8x8xf32>
    %361 = arith.mulf %359, %360 : vector<8x8xf32>
    %362 = arith.addf %355, %361 : vector<8x8xf32>
    %363 = vector.extract_strided_slice %3 {offsets = [0, 0, 3], sizes = [1, 8, 1], strides = [1, 1, 1]} : vector<3x8x8xf32> to vector<1x8x1xf32>
    %364 = vector.shape_cast %363 : vector<1x8x1xf32> to vector<8x1xf32>
    %365 = vector.extract_strided_slice %340 {offsets = [3, 0], sizes = [1, 8], strides = [1, 1]} : vector<8x8xf32> to vector<1x8xf32>
    %366 = vector.broadcast %364 : vector<8x1xf32> to vector<8x8xf32>
    %367 = vector.broadcast %365 : vector<1x8xf32> to vector<8x8xf32>
    %368 = arith.mulf %366, %367 : vector<8x8xf32>
    %369 = arith.addf %362, %368 : vector<8x8xf32>
    %370 = vector.extract_strided_slice %3 {offsets = [0, 0, 4], sizes = [1, 8, 1], strides = [1, 1, 1]} : vector<3x8x8xf32> to vector<1x8x1xf32>
    %371 = vector.shape_cast %370 : vector<1x8x1xf32> to vector<8x1xf32>
    %372 = vector.extract_strided_slice %340 {offsets = [4, 0], sizes = [1, 8], strides = [1, 1]} : vector<8x8xf32> to vector<1x8xf32>
    %373 = vector.broadcast %371 : vector<8x1xf32> to vector<8x8xf32>
    %374 = vector.broadcast %372 : vector<1x8xf32> to vector<8x8xf32>
    %375 = arith.mulf %373, %374 : vector<8x8xf32>
    %376 = arith.addf %369, %375 : vector<8x8xf32>
    %377 = vector.extract_strided_slice %3 {offsets = [0, 0, 5], sizes = [1, 8, 1], strides = [1, 1, 1]} : vector<3x8x8xf32> to vector<1x8x1xf32>
    %378 = vector.shape_cast %377 : vector<1x8x1xf32> to vector<8x1xf32>
    %379 = vector.extract_strided_slice %340 {offsets = [5, 0], sizes = [1, 8], strides = [1, 1]} : vector<8x8xf32> to vector<1x8xf32>
    %380 = vector.broadcast %378 : vector<8x1xf32> to vector<8x8xf32>
    %381 = vector.broadcast %379 : vector<1x8xf32> to vector<8x8xf32>
    %382 = arith.mulf %380, %381 : vector<8x8xf32>
    %383 = arith.addf %376, %382 : vector<8x8xf32>
    %384 = vector.extract_strided_slice %3 {offsets = [0, 0, 6], sizes = [1, 8, 1], strides = [1, 1, 1]} : vector<3x8x8xf32> to vector<1x8x1xf32>
    %385 = vector.shape_cast %384 : vector<1x8x1xf32> to vector<8x1xf32>
    %386 = vector.extract_strided_slice %340 {offsets = [6, 0], sizes = [1, 8], strides = [1, 1]} : vector<8x8xf32> to vector<1x8xf32>
    %387 = vector.broadcast %385 : vector<8x1xf32> to vector<8x8xf32>
    %388 = vector.broadcast %386 : vector<1x8xf32> to vector<8x8xf32>
    %389 = arith.mulf %387, %388 : vector<8x8xf32>
    %390 = arith.addf %383, %389 : vector<8x8xf32>
    %391 = vector.extract_strided_slice %3 {offsets = [0, 0, 7], sizes = [1, 8, 1], strides = [1, 1, 1]} : vector<3x8x8xf32> to vector<1x8x1xf32>
    %392 = vector.shape_cast %391 : vector<1x8x1xf32> to vector<8x1xf32>
    %393 = vector.extract_strided_slice %340 {offsets = [7, 0], sizes = [1, 8], strides = [1, 1]} : vector<8x8xf32> to vector<1x8xf32>
    %394 = vector.broadcast %392 : vector<8x1xf32> to vector<8x8xf32>
    %395 = vector.broadcast %393 : vector<1x8xf32> to vector<8x8xf32>
    %396 = arith.mulf %394, %395 : vector<8x8xf32>
    %397 = arith.addf %390, %396 : vector<8x8xf32>
    %398 = vector.extract_strided_slice %3 {offsets = [1, 0, 0], sizes = [1, 8, 1], strides = [1, 1, 1]} : vector<3x8x8xf32> to vector<1x8x1xf32>
    %399 = vector.shape_cast %398 : vector<1x8x1xf32> to vector<8x1xf32>
    %400 = vector.extract_strided_slice %338 {offsets = [0, 0], sizes = [1, 8], strides = [1, 1]} : vector<8x8xf32> to vector<1x8xf32>
    %401 = vector.broadcast %399 : vector<8x1xf32> to vector<8x8xf32>
    %402 = vector.broadcast %400 : vector<1x8xf32> to vector<8x8xf32>
    %403 = arith.mulf %401, %402 : vector<8x8xf32>
    %404 = arith.addf %397, %403 : vector<8x8xf32>
    %405 = vector.extract_strided_slice %3 {offsets = [1, 0, 1], sizes = [1, 8, 1], strides = [1, 1, 1]} : vector<3x8x8xf32> to vector<1x8x1xf32>
    %406 = vector.shape_cast %405 : vector<1x8x1xf32> to vector<8x1xf32>
    %407 = vector.extract_strided_slice %338 {offsets = [1, 0], sizes = [1, 8], strides = [1, 1]} : vector<8x8xf32> to vector<1x8xf32>
    %408 = vector.broadcast %406 : vector<8x1xf32> to vector<8x8xf32>
    %409 = vector.broadcast %407 : vector<1x8xf32> to vector<8x8xf32>
    %410 = arith.mulf %408, %409 : vector<8x8xf32>
    %411 = arith.addf %404, %410 : vector<8x8xf32>
    %412 = vector.extract_strided_slice %3 {offsets = [1, 0, 2], sizes = [1, 8, 1], strides = [1, 1, 1]} : vector<3x8x8xf32> to vector<1x8x1xf32>
    %413 = vector.shape_cast %412 : vector<1x8x1xf32> to vector<8x1xf32>
    %414 = vector.extract_strided_slice %338 {offsets = [2, 0], sizes = [1, 8], strides = [1, 1]} : vector<8x8xf32> to vector<1x8xf32>
    %415 = vector.broadcast %413 : vector<8x1xf32> to vector<8x8xf32>
    %416 = vector.broadcast %414 : vector<1x8xf32> to vector<8x8xf32>
    %417 = arith.mulf %415, %416 : vector<8x8xf32>
    %418 = arith.addf %411, %417 : vector<8x8xf32>
    %419 = vector.extract_strided_slice %3 {offsets = [1, 0, 3], sizes = [1, 8, 1], strides = [1, 1, 1]} : vector<3x8x8xf32> to vector<1x8x1xf32>
    %420 = vector.shape_cast %419 : vector<1x8x1xf32> to vector<8x1xf32>
    %421 = vector.extract_strided_slice %338 {offsets = [3, 0], sizes = [1, 8], strides = [1, 1]} : vector<8x8xf32> to vector<1x8xf32>
    %422 = vector.broadcast %420 : vector<8x1xf32> to vector<8x8xf32>
    %423 = vector.broadcast %421 : vector<1x8xf32> to vector<8x8xf32>
    %424 = arith.mulf %422, %423 : vector<8x8xf32>
    %425 = arith.addf %418, %424 : vector<8x8xf32>
    %426 = vector.extract_strided_slice %3 {offsets = [1, 0, 4], sizes = [1, 8, 1], strides = [1, 1, 1]} : vector<3x8x8xf32> to vector<1x8x1xf32>
    %427 = vector.shape_cast %426 : vector<1x8x1xf32> to vector<8x1xf32>
    %428 = vector.extract_strided_slice %338 {offsets = [4, 0], sizes = [1, 8], strides = [1, 1]} : vector<8x8xf32> to vector<1x8xf32>
    %429 = vector.broadcast %427 : vector<8x1xf32> to vector<8x8xf32>
    %430 = vector.broadcast %428 : vector<1x8xf32> to vector<8x8xf32>
    %431 = arith.mulf %429, %430 : vector<8x8xf32>
    %432 = arith.addf %425, %431 : vector<8x8xf32>
    %433 = vector.extract_strided_slice %3 {offsets = [1, 0, 5], sizes = [1, 8, 1], strides = [1, 1, 1]} : vector<3x8x8xf32> to vector<1x8x1xf32>
    %434 = vector.shape_cast %433 : vector<1x8x1xf32> to vector<8x1xf32>
    %435 = vector.extract_strided_slice %338 {offsets = [5, 0], sizes = [1, 8], strides = [1, 1]} : vector<8x8xf32> to vector<1x8xf32>
    %436 = vector.broadcast %434 : vector<8x1xf32> to vector<8x8xf32>
    %437 = vector.broadcast %435 : vector<1x8xf32> to vector<8x8xf32>
    %438 = arith.mulf %436, %437 : vector<8x8xf32>
    %439 = arith.addf %432, %438 : vector<8x8xf32>
    %440 = vector.extract_strided_slice %3 {offsets = [1, 0, 6], sizes = [1, 8, 1], strides = [1, 1, 1]} : vector<3x8x8xf32> to vector<1x8x1xf32>
    %441 = vector.shape_cast %440 : vector<1x8x1xf32> to vector<8x1xf32>
    %442 = vector.extract_strided_slice %338 {offsets = [6, 0], sizes = [1, 8], strides = [1, 1]} : vector<8x8xf32> to vector<1x8xf32>
    %443 = vector.broadcast %441 : vector<8x1xf32> to vector<8x8xf32>
    %444 = vector.broadcast %442 : vector<1x8xf32> to vector<8x8xf32>
    %445 = arith.mulf %443, %444 : vector<8x8xf32>
    %446 = arith.addf %439, %445 : vector<8x8xf32>
    %447 = vector.extract_strided_slice %3 {offsets = [1, 0, 7], sizes = [1, 8, 1], strides = [1, 1, 1]} : vector<3x8x8xf32> to vector<1x8x1xf32>
    %448 = vector.shape_cast %447 : vector<1x8x1xf32> to vector<8x1xf32>
    %449 = vector.extract_strided_slice %338 {offsets = [7, 0], sizes = [1, 8], strides = [1, 1]} : vector<8x8xf32> to vector<1x8xf32>
    %450 = vector.broadcast %448 : vector<8x1xf32> to vector<8x8xf32>
    %451 = vector.broadcast %449 : vector<1x8xf32> to vector<8x8xf32>
    %452 = arith.mulf %450, %451 : vector<8x8xf32>
    %453 = arith.addf %446, %452 : vector<8x8xf32>
    %454 = vector.extract_strided_slice %3 {offsets = [2, 0, 0], sizes = [1, 8, 1], strides = [1, 1, 1]} : vector<3x8x8xf32> to vector<1x8x1xf32>
    %455 = vector.shape_cast %454 : vector<1x8x1xf32> to vector<8x1xf32>
    %456 = vector.extract_strided_slice %342 {offsets = [0, 0], sizes = [1, 8], strides = [1, 1]} : vector<8x8xf32> to vector<1x8xf32>
    %457 = vector.broadcast %455 : vector<8x1xf32> to vector<8x8xf32>
    %458 = vector.broadcast %456 : vector<1x8xf32> to vector<8x8xf32>
    %459 = arith.mulf %457, %458 : vector<8x8xf32>
    %460 = arith.addf %453, %459 : vector<8x8xf32>
    %461 = vector.extract_strided_slice %3 {offsets = [2, 0, 1], sizes = [1, 8, 1], strides = [1, 1, 1]} : vector<3x8x8xf32> to vector<1x8x1xf32>
    %462 = vector.shape_cast %461 : vector<1x8x1xf32> to vector<8x1xf32>
    %463 = vector.extract_strided_slice %342 {offsets = [1, 0], sizes = [1, 8], strides = [1, 1]} : vector<8x8xf32> to vector<1x8xf32>
    %464 = vector.broadcast %462 : vector<8x1xf32> to vector<8x8xf32>
    %465 = vector.broadcast %463 : vector<1x8xf32> to vector<8x8xf32>
    %466 = arith.mulf %464, %465 : vector<8x8xf32>
    %467 = arith.addf %460, %466 : vector<8x8xf32>
    %468 = vector.extract_strided_slice %3 {offsets = [2, 0, 2], sizes = [1, 8, 1], strides = [1, 1, 1]} : vector<3x8x8xf32> to vector<1x8x1xf32>
    %469 = vector.shape_cast %468 : vector<1x8x1xf32> to vector<8x1xf32>
    %470 = vector.extract_strided_slice %342 {offsets = [2, 0], sizes = [1, 8], strides = [1, 1]} : vector<8x8xf32> to vector<1x8xf32>
    %471 = vector.broadcast %469 : vector<8x1xf32> to vector<8x8xf32>
    %472 = vector.broadcast %470 : vector<1x8xf32> to vector<8x8xf32>
    %473 = arith.mulf %471, %472 : vector<8x8xf32>
    %474 = arith.addf %467, %473 : vector<8x8xf32>
    %475 = vector.extract_strided_slice %3 {offsets = [2, 0, 3], sizes = [1, 8, 1], strides = [1, 1, 1]} : vector<3x8x8xf32> to vector<1x8x1xf32>
    %476 = vector.shape_cast %475 : vector<1x8x1xf32> to vector<8x1xf32>
    %477 = vector.extract_strided_slice %342 {offsets = [3, 0], sizes = [1, 8], strides = [1, 1]} : vector<8x8xf32> to vector<1x8xf32>
    %478 = vector.broadcast %476 : vector<8x1xf32> to vector<8x8xf32>
    %479 = vector.broadcast %477 : vector<1x8xf32> to vector<8x8xf32>
    %480 = arith.mulf %478, %479 : vector<8x8xf32>
    %481 = arith.addf %474, %480 : vector<8x8xf32>
    %482 = vector.extract_strided_slice %3 {offsets = [2, 0, 4], sizes = [1, 8, 1], strides = [1, 1, 1]} : vector<3x8x8xf32> to vector<1x8x1xf32>
    %483 = vector.shape_cast %482 : vector<1x8x1xf32> to vector<8x1xf32>
    %484 = vector.extract_strided_slice %342 {offsets = [4, 0], sizes = [1, 8], strides = [1, 1]} : vector<8x8xf32> to vector<1x8xf32>
    %485 = vector.broadcast %483 : vector<8x1xf32> to vector<8x8xf32>
    %486 = vector.broadcast %484 : vector<1x8xf32> to vector<8x8xf32>
    %487 = arith.mulf %485, %486 : vector<8x8xf32>
    %488 = arith.addf %481, %487 : vector<8x8xf32>
    %489 = vector.extract_strided_slice %3 {offsets = [2, 0, 5], sizes = [1, 8, 1], strides = [1, 1, 1]} : vector<3x8x8xf32> to vector<1x8x1xf32>
    %490 = vector.shape_cast %489 : vector<1x8x1xf32> to vector<8x1xf32>
    %491 = vector.extract_strided_slice %342 {offsets = [5, 0], sizes = [1, 8], strides = [1, 1]} : vector<8x8xf32> to vector<1x8xf32>
    %492 = vector.broadcast %490 : vector<8x1xf32> to vector<8x8xf32>
    %493 = vector.broadcast %491 : vector<1x8xf32> to vector<8x8xf32>
    %494 = arith.mulf %492, %493 : vector<8x8xf32>
    %495 = arith.addf %488, %494 : vector<8x8xf32>
    %496 = vector.extract_strided_slice %3 {offsets = [2, 0, 6], sizes = [1, 8, 1], strides = [1, 1, 1]} : vector<3x8x8xf32> to vector<1x8x1xf32>
    %497 = vector.shape_cast %496 : vector<1x8x1xf32> to vector<8x1xf32>
    %498 = vector.extract_strided_slice %342 {offsets = [6, 0], sizes = [1, 8], strides = [1, 1]} : vector<8x8xf32> to vector<1x8xf32>
    %499 = vector.broadcast %497 : vector<8x1xf32> to vector<8x8xf32>
    %500 = vector.broadcast %498 : vector<1x8xf32> to vector<8x8xf32>
    %501 = arith.mulf %499, %500 : vector<8x8xf32>
    %502 = arith.addf %495, %501 : vector<8x8xf32>
    %503 = vector.extract_strided_slice %3 {offsets = [2, 0, 7], sizes = [1, 8, 1], strides = [1, 1, 1]} : vector<3x8x8xf32> to vector<1x8x1xf32>
    %504 = vector.shape_cast %503 : vector<1x8x1xf32> to vector<8x1xf32>
    %505 = vector.extract_strided_slice %342 {offsets = [7, 0], sizes = [1, 8], strides = [1, 1]} : vector<8x8xf32> to vector<1x8xf32>
    %506 = vector.broadcast %504 : vector<8x1xf32> to vector<8x8xf32>
    %507 = vector.broadcast %505 : vector<1x8xf32> to vector<8x8xf32>
    %508 = arith.mulf %506, %507 : vector<8x8xf32>
    %509 = arith.addf %502, %508 : vector<8x8xf32>
    %510 = vector.broadcast %5 : vector<8x1xf32> to vector<8x8xf32>
    %511 = arith.addf %509, %510 : vector<8x8xf32>
    %cst_30 = arith.constant dense<0.000000e+00> : vector<8xf32>
    %512 = vector.multi_reduction <add>, %336, %cst_30 [1] : vector<8x128xf32> to vector<8xf32>
    %513 = vector.shape_cast %512 : vector<8xf32> to vector<8x1xf32>
    %cst_31 = arith.constant dense<0.000000e+00> : vector<8xf32>
    %514 = vector.multi_reduction <add>, %511, %cst_31 [1] : vector<8x8xf32> to vector<8xf32>
    %515 = vector.shape_cast %514 : vector<8xf32> to vector<8x1xf32>
    %cst_32 = arith.constant 4.800000e+01 : f32
    %516 = vector.broadcast %cst_32 : f32 to vector<8x1xf32>
    %517 = arith.mulf %516, %515 : vector<8x1xf32>
    %518 = arith.addf %513, %517 : vector<8x1xf32>
    %cst_33 = arith.constant 0.001953125 : f32
    %519 = vector.broadcast %cst_33 : f32 to vector<8x1xf32>
    %520 = arith.mulf %518, %519 : vector<8x1xf32>
    %521 = vector.broadcast %520 : vector<8x1xf32> to vector<8x128xf32>
    %522 = arith.subf %336, %521 : vector<8x128xf32>
    %523 = vector.broadcast %520 : vector<8x1xf32> to vector<8x8xf32>
    %524 = arith.subf %511, %523 : vector<8x8xf32>
    %525 = arith.mulf %522, %522 : vector<8x128xf32>
    %cst_34 = arith.constant dense<0.000000e+00> : vector<8xf32>
    %526 = vector.multi_reduction <add>, %525, %cst_34 [1] : vector<8x128xf32> to vector<8xf32>
    %527 = vector.shape_cast %526 : vector<8xf32> to vector<8x1xf32>
    %528 = arith.mulf %524, %524 : vector<8x8xf32>
    %cst_35 = arith.constant dense<0.000000e+00> : vector<8xf32>
    %529 = vector.multi_reduction <add>, %528, %cst_35 [1] : vector<8x8xf32> to vector<8xf32>
    %530 = vector.shape_cast %529 : vector<8xf32> to vector<8x1xf32>
    %cst_36 = arith.constant 4.800000e+01 : f32
    %531 = vector.broadcast %cst_36 : f32 to vector<8x1xf32>
    %532 = arith.mulf %531, %530 : vector<8x1xf32>
    %533 = arith.addf %527, %532 : vector<8x1xf32>
    %cst_37 = arith.constant 0.001953125 : f32
    %534 = vector.broadcast %cst_37 : f32 to vector<8x1xf32>
    %535 = arith.mulf %533, %534 : vector<8x1xf32>
    %cst_38 = arith.constant 9.99999974E-6 : f32
    %536 = vector.broadcast %cst_38 : f32 to vector<8x1xf32>
    %537 = arith.addf %535, %536 : vector<8x1xf32>
    %538 = math.rsqrt %537 : vector<8x1xf32>
    %539 = vector.broadcast %538 : vector<8x1xf32> to vector<8x128xf32>
    %540 = arith.mulf %522, %539 : vector<8x128xf32>
    %cst_39 = arith.constant 5.000000e-01 : f32
    %541 = vector.broadcast %cst_39 : f32 to vector<8x128xf32>
    %542 = arith.mulf %541, %540 : vector<8x128xf32>
    %cst_40 = arith.constant 0.707106769 : f32
    %543 = vector.broadcast %cst_40 : f32 to vector<8x128xf32>
    %544 = arith.mulf %540, %543 : vector<8x128xf32>
    %545 = math.erf %544 : vector<8x128xf32>
    %cst_41 = arith.constant 1.000000e+00 : f32
    %546 = vector.broadcast %cst_41 : f32 to vector<8x128xf32>
    %547 = arith.addf %546, %545 : vector<8x128xf32>
    %548 = arith.mulf %542, %547 : vector<8x128xf32>
    %549 = arith.addf %548, %152 : vector<8x128xf32>
    %550 = vector.broadcast %538 : vector<8x1xf32> to vector<8x8xf32>
    %551 = arith.mulf %524, %550 : vector<8x8xf32>
    %cst_42 = arith.constant 5.000000e-01 : f32
    %552 = vector.broadcast %cst_42 : f32 to vector<8x8xf32>
    %553 = arith.mulf %552, %551 : vector<8x8xf32>
    %cst_43 = arith.constant 0.707106769 : f32
    %554 = vector.broadcast %cst_43 : f32 to vector<8x8xf32>
    %555 = arith.mulf %551, %554 : vector<8x8xf32>
    %556 = math.erf %555 : vector<8x8xf32>
    %cst_44 = arith.constant 1.000000e+00 : f32
    %557 = vector.broadcast %cst_44 : f32 to vector<8x8xf32>
    %558 = arith.addf %557, %556 : vector<8x8xf32>
    %559 = arith.mulf %553, %558 : vector<8x8xf32>
    %560 = vector.broadcast %161 : vector<8x1xf32> to vector<8x8xf32>
    %561 = arith.addf %559, %560 : vector<8x8xf32>
    %562 = tpu.concatenate %561, %561, %561, %561, %561, %561, %561, %561 in 1 : vector<8x8xf32>, vector<8x8xf32>, vector<8x8xf32>, vector<8x8xf32>, vector<8x8xf32>, vector<8x8xf32>, vector<8x8xf32>, vector<8x8xf32> -> vector<8x64xf32>
    %563 = vector.extract_strided_slice %549 {offsets = [0, 0], sizes = [8, 8], strides = [1, 1]} : vector<8x128xf32> to vector<8x8xf32>
    %564 = vector.extract_strided_slice %549 {offsets = [0, 8], sizes = [8, 8], strides = [1, 1]} : vector<8x128xf32> to vector<8x8xf32>
    %565 = vector.extract_strided_slice %549 {offsets = [0, 16], sizes = [8, 8], strides = [1, 1]} : vector<8x128xf32> to vector<8x8xf32>
    %566 = vector.extract_strided_slice %549 {offsets = [0, 24], sizes = [8, 8], strides = [1, 1]} : vector<8x128xf32> to vector<8x8xf32>
    %567 = tpu.concatenate %563, %561, %564, %561, %565, %561, %566, %561, %562 in 1 : vector<8x8xf32>, vector<8x8xf32>, vector<8x8xf32>, vector<8x8xf32>, vector<8x8xf32>, vector<8x8xf32>, vector<8x8xf32>, vector<8x8xf32>, vector<8x64xf32> -> vector<8x128xf32>
    %c0_45 = arith.constant 0 : index
    %c0_46 = arith.constant 0 : index
    %c0_47 = arith.constant 0 : index
    %568 = vector.load %arg6[%c0_45, %c0_46, %c0_47] : memref<1x8x512xf32, #tpu.memory_space<vmem>>, vector<1x8x128xf32>
    %569 = vector.shape_cast %568 : vector<1x8x128xf32> to vector<8x128xf32>
    %570 = vector.shape_cast %567 : vector<8x128xf32> to vector<1x8x128xf32>
    tpu.vector_store %arg6[%c0_45, %c0_46, %c0_47], %570 {strides = array<i32>} : memref<1x8x512xf32, #tpu.memory_space<vmem>>, vector<1x8x128xf32>,
    %571 = vector.extract_strided_slice %549 {offsets = [0, 32], sizes = [8, 8], strides = [1, 1]} : vector<8x128xf32> to vector<8x8xf32>
    %572 = vector.extract_strided_slice %549 {offsets = [0, 40], sizes = [8, 8], strides = [1, 1]} : vector<8x128xf32> to vector<8x8xf32>
    %573 = vector.extract_strided_slice %549 {offsets = [0, 48], sizes = [8, 8], strides = [1, 1]} : vector<8x128xf32> to vector<8x8xf32>
    %574 = vector.extract_strided_slice %549 {offsets = [0, 56], sizes = [8, 8], strides = [1, 1]} : vector<8x128xf32> to vector<8x8xf32>
    %575 = tpu.concatenate %571, %561, %572, %561, %573, %561, %574, %561, %562 in 1 : vector<8x8xf32>, vector<8x8xf32>, vector<8x8xf32>, vector<8x8xf32>, vector<8x8xf32>, vector<8x8xf32>, vector<8x8xf32>, vector<8x8xf32>, vector<8x64xf32> -> vector<8x128xf32>
    %c0_48 = arith.constant 0 : index
    %c0_49 = arith.constant 0 : index
    %c128 = arith.constant 128 : index
    %576 = vector.load %arg6[%c0_48, %c0_49, %c128] : memref<1x8x512xf32, #tpu.memory_space<vmem>>, vector<1x8x128xf32>
    %577 = vector.shape_cast %576 : vector<1x8x128xf32> to vector<8x128xf32>
    %578 = vector.shape_cast %575 : vector<8x128xf32> to vector<1x8x128xf32>
    tpu.vector_store %arg6[%c0_48, %c0_49, %c128], %578 {strides = array<i32>} : memref<1x8x512xf32, #tpu.memory_space<vmem>>, vector<1x8x128xf32>,
    %579 = vector.extract_strided_slice %549 {offsets = [0, 64], sizes = [8, 8], strides = [1, 1]} : vector<8x128xf32> to vector<8x8xf32>
    %580 = vector.extract_strided_slice %549 {offsets = [0, 72], sizes = [8, 8], strides = [1, 1]} : vector<8x128xf32> to vector<8x8xf32>
    %581 = vector.extract_strided_slice %549 {offsets = [0, 80], sizes = [8, 8], strides = [1, 1]} : vector<8x128xf32> to vector<8x8xf32>
    %582 = vector.extract_strided_slice %549 {offsets = [0, 88], sizes = [8, 8], strides = [1, 1]} : vector<8x128xf32> to vector<8x8xf32>
    %583 = tpu.concatenate %579, %561, %580, %561, %581, %561, %582, %561, %562 in 1 : vector<8x8xf32>, vector<8x8xf32>, vector<8x8xf32>, vector<8x8xf32>, vector<8x8xf32>, vector<8x8xf32>, vector<8x8xf32>, vector<8x8xf32>, vector<8x64xf32> -> vector<8x128xf32>
    %c0_50 = arith.constant 0 : index
    %c0_51 = arith.constant 0 : index
    %c256 = arith.constant 256 : index
    %584 = vector.load %arg6[%c0_50, %c0_51, %c256] : memref<1x8x512xf32, #tpu.memory_space<vmem>>, vector<1x8x128xf32>
    %585 = vector.shape_cast %584 : vector<1x8x128xf32> to vector<8x128xf32>
    %586 = vector.shape_cast %583 : vector<8x128xf32> to vector<1x8x128xf32>
    tpu.vector_store %arg6[%c0_50, %c0_51, %c256], %586 {strides = array<i32>} : memref<1x8x512xf32, #tpu.memory_space<vmem>>, vector<1x8x128xf32>,
    %587 = vector.extract_strided_slice %549 {offsets = [0, 96], sizes = [8, 8], strides = [1, 1]} : vector<8x128xf32> to vector<8x8xf32>
    %588 = vector.extract_strided_slice %549 {offsets = [0, 104], sizes = [8, 8], strides = [1, 1]} : vector<8x128xf32> to vector<8x8xf32>
    %589 = vector.extract_strided_slice %549 {offsets = [0, 112], sizes = [8, 8], strides = [1, 1]} : vector<8x128xf32> to vector<8x8xf32>
    %590 = vector.extract_strided_slice %549 {offsets = [0, 120], sizes = [8, 8], strides = [1, 1]} : vector<8x128xf32> to vector<8x8xf32>
    %591 = tpu.concatenate %587, %561, %588, %561, %589, %561, %590, %561, %562 in 1 : vector<8x8xf32>, vector<8x8xf32>, vector<8x8xf32>, vector<8x8xf32>, vector<8x8xf32>, vector<8x8xf32>, vector<8x8xf32>, vector<8x8xf32>, vector<8x64xf32> -> vector<8x128xf32>
    %c0_52 = arith.constant 0 : index
    %c0_53 = arith.constant 0 : index
    %c384 = arith.constant 384 : index
    %592 = vector.load %arg6[%c0_52, %c0_53, %c384] : memref<1x8x512xf32, #tpu.memory_space<vmem>>, vector<1x8x128xf32>
    %593 = vector.shape_cast %592 : vector<1x8x128xf32> to vector<8x128xf32>
    %594 = vector.shape_cast %591 : vector<8x128xf32> to vector<1x8x128xf32>
    tpu.vector_store %arg6[%c0_52, %c0_53, %c384], %594 {strides = array<i32>} : memref<1x8x512xf32, #tpu.memory_space<vmem>>, vector<1x8x128xf32>,
    return
  }
  func.func @transform_0(%arg0: i32) -> (i32, i32, i32) {
    %c0_i32 = arith.constant 0 : i32
    %c0_i32_0 = arith.constant 0 : i32
    %c0_i32_1 = arith.constant 0 : i32
    return %arg0, %c0_i32, %c0_i32_0 : i32, i32, i32
  }
  func.func @transform_1(%arg0: i32) -> (i32, i32, i32) {
    %c0_i32 = arith.constant 0 : i32
    %c0_i32_0 = arith.constant 0 : i32
    %c0_i32_1 = arith.constant 0 : i32
    %c0_i32_2 = arith.constant 0 : i32
    return %c0_i32, %c0_i32_0, %c0_i32_1 : i32, i32, i32
  }
  func.func @transform_2(%arg0: i32) -> (i32, i32) {
    %c0_i32 = arith.constant 0 : i32
    %c0_i32_0 = arith.constant 0 : i32
    %c0_i32_1 = arith.constant 0 : i32
    return %c0_i32, %c0_i32_0 : i32, i32
  }
  func.func @transform_3(%arg0: i32) -> (i32, i32, i32) {
    %c0_i32 = arith.constant 0 : i32
    %c0_i32_0 = arith.constant 0 : i32
    %c0_i32_1 = arith.constant 0 : i32
    %c0_i32_2 = arith.constant 0 : i32
    return %c0_i32, %c0_i32_0, %c0_i32_1 : i32, i32, i32
  }
  func.func @transform_4(%arg0: i32) -> (i32, i32) {
    %c0_i32 = arith.constant 0 : i32
    %c0_i32_0 = arith.constant 0 : i32
    %c0_i32_1 = arith.constant 0 : i32
    return %c0_i32, %c0_i32_0 : i32, i32
  }
  func.func @transform_5(%arg0: i32) -> (i32, i32, i32) {
    %c0_i32 = arith.constant 0 : i32
    %c0_i32_0 = arith.constant 0 : i32
    %c0_i32_1 = arith.constant 0 : i32
    return %arg0, %c0_i32, %c0_i32_0 : i32, i32, i32
  }
}

</mosaic_0001>

<bundles_post_ra>
// kernel: tpu_custom_call.1
= control target key start
LH: loop header
LB: loop body
LE: loop exit
PB: predicated region body
PF: predicated region fallthrough
CT: control target
= control target key end

     0   :  { %10 = vsyncpa [#allocation3], 0  ;;  %s1665_s0 = inlined_call_operand.vmem [shape: f32[2,4,128], index: 0, kind: input, shape index: {}]   ;;  %s1666_s1 = inlined_call_operand.vmem [shape: f32[3,8,4], index: 1, kind: input, shape index: {}]   ;;  %s1667_s2 = inlined_call_operand.vmem [shape: f32[8,1], index: 2, kind: input, shape index: {}]   ;;  %s1668_s3 = inlined_call_operand.vmem [shape: f32[3,8,8], index: 3, kind: input, shape index: {}]   ;;  %s1669_s4 = inlined_call_operand.vmem [shape: f32[8,1], index: 4, kind: input, shape index: {}]   ;;  %s1670_s5 = inlined_call_operand.hbm [shape: f32[2,8,512], index: 5, kind: output, shape index: {}]  }
   0x1   :  { %12 = vsyncpa [#allocation3 + $0x1], 0  ;;  %s1314_s18 = smov 0   ;;  %s1316_s19 = smov 0  }
   0x2   :  { %s1318_s20 = smov 0   ;;  %s1320_s21 = smov 0  }
   0x3 LB: > { %s1335_s22 = sadd.s32 4294967295, %s1255_s21   ;;  %s1051_s23 = sadd.s32 4294967294, %s1255_s21   ;;  %s1255_s21 = sphi %s1320_s21, %s1676_s21   ;;  %s1251_s20 = sphi %s1318_s20, %s1675_s20   ;;  %s1247_s19 = sphi %s1316_s19, %s1674_s19   ;;  %s1243_s18 = sphi %s1314_s18, %s1673_s18  }
   0x4   : > { %s1339_s24 = sadd.s32 1, %s1255_s21   ;;  %s135_s25 = sadd.s32 1, %s1251_s20 }
   0x5   : > { %s132_s26 = ssub.s32 %s1255_s21, %s1339_s24  ;;  %p145_p0 = scmp.ne.s32.totalorder %s1251_s20, %s1247_s19 }
   0x6   : > { %p133_p1 = scmp.eq.s32.totalorder %s132_s26, 0  ;;  %p146_p2 = scmp.eq.s32.totalorder %s1335_s22, 1 }
   0x7   : > { %p151_p3 = scmp.ne.s32.totalorder %s1247_s19, %s1243_s18  ;;  %p152_p4 = scmp.eq.s32.totalorder %s1051_s23, 1 }
   0x8   : > { %s1350_s27 = scalar_select %p133_p1, %s1251_s20, %s135_s25  }
   0x9   : > { %p1352_p5 = por %p146_p2, %p145_p0  ;;  %p1356_p6 = por %p152_p4, %p151_p3 }
   0xa   : > { %p1054_p7 = scmp.ge.s32.totalorder %s1255_s21, 1  ;;  %p189_p8 = scmp.lt.s32.totalorder %s1255_s21, 3 }
   0xc   : > { %p190_p9 = pnand %p1054_p7, %p189_p8 }
   0xd   : > { %p216_p10 = scmp.lt.s32.totalorder (!%p190_p9), %s1335_s22, 1  ;;  %s1261_s12 = smov (!%p190_p9), 1  }
   0xe   : > { %193 = sbr.rel (%p190_p9) target bundleno = 1534 (0x5fe), region = 40  ;;  %s1262_s17 = smov (!%p190_p9), 127  }
   0xf   : > { %s1268_s26 = smov (!%p190_p9), 16   ;;  %s1269_s30 = smov (!%p190_p9), 8  }
  0x10   : > { %s1270_s6 = smov (!%p190_p9), 40   ;;  %s1273_s9 = smov (!%p190_p9), 32  }
  0x11   : > { %s1274_s10 = smov (!%p190_p9), 48  }
  0x13   : > { %v221_v0 = vld [vmem:[%s1666_s1] sm:$0xff]  ;;  %v1257_v1 = vmov 2   ;;  %v1258_v2 = vmov 1   ;;  %s217_s7 = scalar_select %p216_p10, %s1335_s22, 1  ;;  %v1259_v4 = vmov 0   ;;  %v1260_v5 = vmov 3  }
  0x14   : > { %1148 = vset.pattern.permute.xlu1 %v1257_v1  ;;  %1146 = vset.pattern.permute.xlu0 %v1258_v2  ;;  %v222_v6 = vld [vmem:[%s1666_s1 + $0x8] sm:$0xff]  ;;  %v223_v7 = vld [vmem:[%s1666_s1 + $0x10] sm:$0xff]  ;;  %v229_v8 = vlaneseq  ;;  %v1263_v14 = vmov 0.0   ;;  %vm820_vm2 = vcmask 64512   ;;  %vm878_vm3 = vcmask 130048  }
  0x15   : > { %276 = vperm.xlu1 %1148, %v221_v0   ;;  %266 = vperm.xlu0 %1146, %v221_v0   ;;  %s1056_s8 = sshll.u32 %s217_s7, 2  ;;  %s1271_s7 = smov 24   ;;  %vm880_vm4 = vcmask 195584   ;;  %vm882_vm5 = vcmask 261120   ;;  %vm884_vm6 = vcmask 326656   ;;  %vm886_vm7 = vcmask 392192  }
  0x16   : > { %s219_s11 = scalar_lea.vmem %s1665_s0, %s1056_s8  ;;  %v230_v9 = vand.u32 127, %v229_v8  ;;  %v1395_v11 = vshrl.u32 %v229_v8, 7  ;;  %s1272_s8 = smov 56   ;;  %vm888_vm8 = vcmask 457728   ;;  %vm911_vm9 = vcmask 523264  }
  0x17   : > { %v1372_v3 = vld [vmem:[%s219_s11] sm:$0xf]  ;;  %s1275_s11 = smov 64  }
  0x18   : > { %v235_v10 = vand.u32 7, %v230_v9  ;;  %v1400_v16 = vsub.s32 0, %v1395_v11  ;;  %v1403_v17 = vsub.s32 1, %v1395_v11  ;;  %v1406_v18 = vsub.s32 2, %v1395_v11 }
  0x19   : > { %1147 = vset.pattern.permute.xlu0 %v1259_v4  ;;  %1149 = vset.pattern.permute.xlu1 %v1260_v5  ;;  %v1413_v25 = vsub.s32 3, %v1395_v11 }
  0x1a   : > { %249 = vrot.lane.b32.xlu1 %v1372_v3, %s1261_s12  ;;  %257 = vperm.xlu0 %1147, %v221_v0   ;;  %vm243_vm0 = vcmp.ne.s32.totalorder %v235_v10, 0  ;;  %v303_v33 = vrot.slane %v1372_v3, %v1400_v16  ;;  %v313_v39 = vrot.slane %v1372_v3, %v1403_v17  ;;  %v323_v42 = vrot.slane %v1372_v3, %v1406_v18 }
  0x1b   : > { %v1397_v15 = vsel %vm243_vm0, 1.0, %v1263_v14  ;;  %vm246_vm1 = vcmp.ne.s32.totalorder %v235_v10, 7  ;;  %v333_v47 = vrot.slane %v1372_v3, %v1413_v25  ;;  %v227_v10 = vld [vmem:[%s1667_s2] sm:$0xff] }
  0x1c   : > { %v1424_v49 = vsel %vm246_vm1, 1.0, %v1263_v14 }
  0x1e   : > { %286 = vperm.xlu1 %1149, %v221_v0   ;;  %297 = vperm.xlu0 %1147, %v222_v6  }
  0x22   : > { %1150 = vset.pattern.permute.xlu1 %v1258_v2  ;;  %1152 = vset.pattern.permute.xlu0 %v1260_v5 }
  0x23   : > { %307 = vperm.xlu1 %1150, %v222_v6   ;;  %327 = vperm.xlu0 %1152, %v222_v6  }
  0x27   : > { %1151 = vset.pattern.permute.xlu1 %v1257_v1  ;;  %1154 = vset.pattern.permute.xlu0 %v1258_v2 }
  0x28   : > { %317 = vperm.xlu1 %1151, %v222_v6   ;;  %348 = vperm.xlu0 %1154, %v223_v7  }
  0x2c   : > { %1153 = vset.pattern.permute.xlu1 %v1259_v4  ;;  %1158 = vset.pattern.permute.xlu0 %v1259_v4 }
  0x2d   : > { %338 = vperm.xlu1 %1153, %v223_v7  }
  0x31   : > { %252 = vrot.lane.b32.xlu1 %v1372_v3, %s1262_s17 }
  0x32   : > { %1155 = vset.pattern.permute.xlu1 %v1257_v1 }
  0x35   : > { %358 = vperm.xlu1 %1155, %v223_v7  }
  0x39   : > { %1156 = vset.pattern.permute.xlu1 %v1260_v5 }
  0x3a   : > { %368 = vperm.xlu1 %1156, %v223_v7  }
  0x3e   : > { %1157 = vset.pattern.permute.xlu1 %v1259_v4 }
  0x90   : > { %v277_v12 = vpop.permute.xlu1 %276  ;;  %v267_v13 = vpop.permute.xlu0 %266 }
  0x94   : > { %v250_v19 = vpop.permute.xlu1 %249 }
  0x95   : > { %v251_v20 = vmul.f32 %v1397_v15, %v250_v19  ;;  %v258_v21 = vpop.permute.xlu0 %257 }
  0x97   : > { %v263_v22 = vrot.slane %v251_v20, %v1400_v16  ;;  %v272_v23 = vrot.slane %v251_v20, %v1403_v17  ;;  %v282_v24 = vrot.slane %v251_v20, %v1406_v18  ;;  %v292_v31 = vrot.slane %v251_v20, %v1413_v25 }
  0x99   : > { %v264_v26 = vmul.f32 %v263_v22, %v258_v21  ;;  %v273_v27 = vmul.f32 %v272_v23, %v267_v13  ;;  %v287_v28 = vpop.permute.xlu1 %286  ;;  %v283_v30 = vmul.f32 %v282_v24, %v277_v12  ;;  %v298_v34 = vpop.permute.xlu0 %297  ;;  %v224_v23 = vld [vmem:[%s1668_s3] sm:$0xff]  ;;  %v1264_v24 = vmov 5  }
  0x9a   : > { %v293_v36 = vmul.f32 %v292_v31, %v287_v28  ;;  %v304_v38 = vmul.f32 %v303_v33, %v298_v34 }
  0x9b   : > { %v274_v29 = vadd.f32 %v273_v27, %v264_v26  ;;  %v1265_v26 = vmov 6   ;;  %v1448_v27 = vld [vmem:[%s1668_s3 + $0x8] sm:$0xff] }
  0x9d   : > { %v284_v32 = vadd.f32 %v283_v30, %v274_v29 }
  0x9e   : > { %v308_v35 = vpop.permute.xlu1 %307  ;;  %v328_v48 = vpop.permute.xlu0 %327 }
  0x9f   : > { %v294_v37 = vadd.f32 %v293_v36, %v284_v32  ;;  %v314_v43 = vmul.f32 %v313_v39, %v308_v35  ;;  %v334_v52 = vmul.f32 %v333_v47, %v328_v48 }
  0xa1   : > { %v305_v41 = vadd.f32 %v304_v38, %v294_v37  ;;  %v1266_v37 = vmov 4   ;;  %v1267_v38 = vmov 7  }
  0xa3   : > { %v318_v40 = vpop.permute.xlu1 %317  ;;  %v315_v45 = vadd.f32 %v314_v43, %v305_v41  ;;  %v349_v56 = vpop.permute.xlu0 %348 }
  0xa4   : > { %v324_v46 = vmul.f32 %v323_v42, %v318_v40 }
  0xa6   : > { %v325_v51 = vadd.f32 %v324_v46, %v315_v45  ;;  %v226_v46 = vld [vmem:[%s1668_s3 + $0x10] sm:$0xff] }
  0xa8   : > { %v339_v44 = vpop.permute.xlu1 %338  ;;  %v335_v58 = vadd.f32 %v334_v52, %v325_v51  ;;  %v228_v52 = vld [vmem:[%s1669_s4] sm:$0xff] }
  0xac   : > { %v253_v50 = vpop.permute.xlu1 %252 }
  0xad   : > { %v254_v53 = vmul.f32 %v1424_v49, %v253_v50 }
  0xaf   : > { %v344_v54 = vrot.slane %v254_v53, %v1400_v16  ;;  %v354_v55 = vrot.slane %v254_v53, %v1403_v17  ;;  %v364_v60 = vrot.slane %v254_v53, %v1406_v18  ;;  %v374_v63 = vrot.slane %v254_v53, %v1413_v25 }
  0xb0   : > { %v359_v57 = vpop.permute.xlu1 %358 }
  0xb1   : > { %v345_v59 = vmul.f32 %v344_v54, %v339_v44  ;;  %v355_v62 = vmul.f32 %v354_v55, %v349_v56  ;;  %v365_v3 = vmul.f32 %v364_v60, %v359_v57 }
  0xb3   : > { %v346_v61 = vadd.f32 %v345_v59, %v335_v58 }
  0xb5   : > { %v356_v0 = vadd.f32 %v355_v62, %v346_v61  ;;  %v369_v6 = vpop.permute.xlu1 %368 }
  0xb6   : > { %v375_v7 = vmul.f32 %v374_v63, %v369_v6 }
  0xb7   : > { %v366_v8 = vadd.f32 %v365_v3, %v356_v0 }
  0xb9   : > { %v376_v9 = vadd.f32 %v375_v7, %v366_v8 }
  0xbb   : > { %377 = vadd.xlane.f32.xlu0 %v376_v9 }
 0x144   : > { %v378_v12 = vpop.xlane.xlu0 %377 }
 0x145   : > { %v379_v13 = vmul.f32 0.001953125, %v378_v12 }
 0x147   : > { %v380_v14 = vadd.f32 %v379_v13, %v227_v10 }
 0x149   : > { %v381_v19 = vsub.f32 %v227_v10, %v380_v14  ;;  %v1503_v14 = vsub.s32 4, %v1395_v11 }
 0x14b   : > { %384 = vperm.xlu1 %1157, %v381_v19   ;;  %v391_v28 = vmul.f32 %v381_v19, %v381_v19 }
 0x14d   : > { %v392_v29 = vmul.f32 384.0, %v391_v28  ;;  %v1511_v28 = vsub.s32 6, %v1395_v11 }
 0x1c6   : > { %v385_v20 = vpop.permute.xlu1 %384 }
 0x1c7   : > { %v1434_v21 = vadd.f32 %v385_v20, %v376_v9 }
 0x1c9   : > { %v388_v22 = vmul.f32 %v1434_v21, %v1434_v21 }
 0x1cb   : > { %389 = vadd.xlane.f32.xlu1 %v388_v22  ;;  %v1507_v22 = vsub.s32 5, %v1395_v11 }
 0x1dc   : > { %422 = vperm.xlu1 %1157, %v224_v23  }
 0x1e0   : > { %1159 = vset.pattern.permute.xlu1 %v1258_v2 }
 0x1e1   : > { %431 = vperm.xlu1 %1159, %v224_v23  }
 0x1e5   : > { %1160 = vset.pattern.permute.xlu1 %v1257_v1 }
 0x1e6   : > { %441 = vperm.xlu1 %1160, %v224_v23  }
 0x1ea   : > { %1161 = vset.pattern.permute.xlu1 %v1260_v5 }
 0x1eb   : > { %451 = vperm.xlu1 %1161, %v224_v23  }
 0x1ef   : > { %1163 = vset.pattern.permute.xlu1 %v1264_v24 }
 0x1f0   : > { %471 = vperm.xlu1 %1163, %v224_v23  }
 0x1f4   : > { %1164 = vset.pattern.permute.xlu1 %v1265_v26 }
 0x1f5   : > { %481 = vperm.xlu1 %1164, %v224_v23  }
 0x1f9   : > { %1166 = vset.pattern.permute.xlu1 %v1259_v4 }
 0x1fa   : > { %502 = vperm.xlu1 %1166, %v1448_v27  }
 0x254   : > { %v390_v30 = vpop.xlane.xlu1 %389 }
 0x255   : > { %v393_v31 = vadd.f32 %v392_v29, %v390_v30 }
 0x257   : > { %v394_v32 = vmul.f32 0.001953125, %v393_v31 }
 0x259   : > { %v395_v33 = vadd.f32 1e-05, %v394_v32 }
 0x25b   : > { %1183 = vrsqrt.f32 %v395_v33  ;;  %v1516_v33 = vsub.s32 7, %v1395_v11 }
 0x268   : > { %v1184_v34 = vpop.eup %1183 }
 0x269   : > { %v408_v35 = vmul.f32 %v1184_v34, %v381_v19  ;;  %399 = vperm.xlu0 %1158, %v1184_v34  }
 0x26b   : > { %v410_v36 = vmul.f32 0.70710677, %v408_v35  ;;  %v409_v40 = vmul.f32 0.5, %v408_v35 }
 0x26d   : > { %1185 = verf.f32 %v410_v36  ;;  %1162 = vset.pattern.permute.xlu0 %v1266_v37 }
 0x26e   : > { %461 = vperm.xlu0 %1162, %v224_v23  }
 0x272   : > { %1165 = vset.pattern.permute.xlu0 %v1267_v38 }
 0x273   : > { %491 = vperm.xlu0 %1165, %v224_v23  }
 0x277   : > { %1168 = vset.pattern.permute.xlu0 %v1257_v1 }
 0x278   : > { %522 = vperm.xlu0 %1168, %v1448_v27  }
 0x27a   : > { %v1186_v39 = vpop.eup %1185 }
 0x27b   : > { %v412_v41 = vadd.f32 1.0, %v1186_v39 }
 0x27c   : > { %1171 = vset.pattern.permute.xlu0 %v1264_v24 }
 0x27d   : > { %v413_v42 = vmul.f32 %v412_v41, %v409_v40  ;;  %552 = vperm.xlu0 %1171, %v1448_v27  }
 0x27f   : > { %670 = vperm.xlu1 %1166, %v413_v42   ;;  %1065 = vpush %v413_v42  ;;  %v727_v43 = vrot.slane %v413_v42, 1  ;;  %v733_v44 = vrot.slane %v413_v42, 2  ;;  %v739_v45 = vrot.slane %v413_v42, 3  ;;  %v745_v47 = vrot.slane %v413_v42, 4 }
 0x280   : > { %v751_v48 = vrot.slane %v413_v42, 5  ;;  %v757_v50 = vrot.slane %v413_v42, 6  ;;  %v763_v51 = vrot.slane %v413_v42, 7 }
 0x281   : > { %1174 = vset.pattern.permute.xlu0 %v1259_v4  ;;  %1067 = vpush %v727_v43 }
 0x282   : > { %1069 = vpush %v733_v44  ;;  %583 = vperm.xlu0 %1174, %v226_v46  }
 0x283   : > { %1071 = vpush %v739_v45  ;;  %1167 = vset.pattern.permute.xlu1 %v1258_v2 }
 0x284   : > { %1073 = vpush %v745_v47  ;;  %512 = vperm.xlu1 %1167, %v1448_v27  }
 0x285   : > { %1075 = vpush %v751_v48 }
 0x286   : > { %1077 = vpush %v757_v50  ;;  %1176 = vset.pattern.permute.xlu0 %v1257_v1 }
 0x287   : > { %1079 = vpush %v763_v51  ;;  %603 = vperm.xlu0 %1176, %v226_v46  }
 0x288   : > { %1169 = vset.pattern.permute.xlu1 %v1260_v5 }
 0x28b   : > { %1179 = vset.pattern.permute.xlu0 %v1264_v24 }
 0x28c   : > { %633 = vperm.xlu0 %1179, %v226_v46  }
 0x290   : > { %1182 = vset.pattern.permute.xlu0 %v1259_v4  ;;  %v423_v4 = vpop.permute.xlu1 %422 }
 0x291   : > { %664 = vperm.xlu0 %1182, %v228_v52  }
 0x294   : > { %v432_v59 = vpop.permute.xlu1 %431 }
 0x298   : > { %v442_v60 = vpop.permute.xlu1 %441 }
 0x2e4   : > { %v400_v53 = vpop.permute.xlu0 %399 }
 0x2e5   : > { %v402_v54 = vmul.f32 %v400_v53, %v1434_v21 }
 0x2e7   : > { %v404_v55 = vmul.f32 0.70710677, %v402_v54  ;;  %v403_v1 = vmul.f32 0.5, %v402_v54 }
 0x2e9   : > { %1187 = verf.f32 %v404_v55  ;;  %v462_v24 = vpop.permute.xlu0 %461 }
 0x2ee   : > { %v492_v40 = vpop.permute.xlu0 %491 }
 0x2f6   : > { %v1188_v56 = vpop.eup %1187 }
 0x2f7   : > { %v406_v57 = vadd.f32 1.0, %v1188_v56 }
 0x2f9   : > { %v1470_v58 = vmul.f32 %v406_v57, %v403_v1 }
 0x2fb   : > { %414 = vrot.lane.b32.xlu1 %v1470_v58, %s1261_s12  ;;  %s1066_s12 = spop %1065 }
 0x2fc   : > { %v723_v11 = vstv %s1066_s12  ;;  %s1068_s13 = spop %1067  ;;  %s1276_s12 = smov 96  }
 0x2fd   : > { %s1070_s14 = spop %1069  ;;  %v729_v1 = vstv %s1068_s13  ;;  %s1277_s13 = smov 72  }
 0x2fe   : > { %s1072_s15 = spop %1071 }
 0x2ff   : > { %532 = vperm.xlu1 %1169, %v1448_v27   ;;  %s1074_s16 = spop %1073 }
 0x303   : > { %1170 = vset.pattern.permute.xlu1 %v1266_v37 }
 0x304   : > { %542 = vperm.xlu1 %1170, %v1448_v27  }
 0x308   : > { %1172 = vset.pattern.permute.xlu1 %v1265_v26 }
 0x309   : > { %562 = vperm.xlu1 %1172, %v1448_v27  }
 0x30d   : > { %1173 = vset.pattern.permute.xlu1 %v1267_v38 }
 0x30e   : > { %572 = vperm.xlu1 %1173, %v1448_v27  }
 0x312   : > { %1175 = vset.pattern.permute.xlu1 %v1258_v2  ;;  %v452_v2 = vpop.permute.xlu1 %451 }
 0x313   : > { %593 = vperm.xlu1 %1175, %v226_v46  }
 0x316   : > { %v1488_v61 = vpop.permute.xlu1 %471 }
 0x317   : > { %1177 = vset.pattern.permute.xlu1 %v1260_v5 }
 0x318   : > { %613 = vperm.xlu1 %1177, %v226_v46  }
 0x31a   : > { %v1490_v5 = vpop.permute.xlu1 %481 }
 0x31c   : > { %417 = vrot.lane.b32.xlu1 %v1470_v58, %s1262_s17  ;;  %s1076_s17 = spop %1075 }
 0x31d   : > { %1178 = vset.pattern.permute.xlu1 %v1266_v37  ;;  %s1078_s23 = spop %1077 }
 0x31e   : > { %v1492_v62 = vpop.permute.xlu1 %502  ;;  %s1080_s25 = spop %1079 }
 0x31f   : > { %v725_v52 = vmul.f32 %v723_v11, %v1492_v62 }
 0x320   : > { %623 = vperm.xlu1 %1178, %v226_v46  }
 0x322   : > { %v1494_v63 = vpop.permute.xlu1 %670 }
 0x323   : > { %v673_v0 = vmul.f32 %v1397_v15, %v1494_v63 }
 0x324   : > { %1180 = vset.pattern.permute.xlu1 %v1265_v26 }
 0x325   : > { %643 = vperm.xlu1 %1180, %v226_v46   ;;  %v678_v3 = vrot.slane %v673_v0, %v1400_v16  ;;  %v683_v6 = vrot.slane %v673_v0, %v1403_v17  ;;  %v689_v9 = vrot.slane %v673_v0, %v1406_v18  ;;  %v695_v13 = vrot.slane %v673_v0, %v1413_v25 }
 0x326   : > { %v701_v21 = vrot.slane %v673_v0, %v1503_v14  ;;  %v707_v27 = vrot.slane %v673_v0, %v1507_v22  ;;  %v713_v31 = vrot.slane %v673_v0, %v1511_v28  ;;  %v513_v32 = vpop.permute.xlu1 %512  ;;  %v719_v36 = vrot.slane %v673_v0, %v1516_v33 }
 0x327   : > { %v679_v7 = vmul.f32 %v678_v3, %v423_v4  ;;  %v684_v8 = vmul.f32 %v683_v6, %v432_v59  ;;  %v690_v12 = vmul.f32 %v689_v9, %v442_v60  ;;  %v696_v20 = vmul.f32 %v695_v13, %v452_v2  ;;  %v523_v3 = vpop.permute.xlu0 %522 }
 0x328   : > { %v702_v26 = vmul.f32 %v701_v21, %v462_v24  ;;  %v708_v30 = vmul.f32 %v707_v27, %v1488_v61  ;;  %v714_v35 = vmul.f32 %v713_v31, %v1490_v5  ;;  %v720_v44 = vmul.f32 %v719_v36, %v492_v40 }
 0x329   : > { %1181 = vset.pattern.permute.xlu1 %v1267_v38  ;;  %v685_v10 = vadd.f32 %v684_v8, %v679_v7  ;;  %v731_v0 = vmul.f32 %v729_v1, %v513_v32  ;;  %v735_v9 = vstv %s1070_s14  ;;  %s1278_s14 = smov 104  }
 0x32a   : > { %653 = vperm.xlu1 %1181, %v226_v46  }
 0x32b   : > { %v691_v19 = vadd.f32 %v690_v12, %v685_v10  ;;  %v741_v10 = vstv %s1072_s15  ;;  %v553_v36 = vpop.permute.xlu0 %552  ;;  %s1279_s15 = smov 80  }
 0x32d   : > { %v697_v23 = vadd.f32 %v696_v20, %v691_v19  ;;  %v508_v19 = vrot.slane %v1470_v58, %v1400_v16  ;;  %v737_v20 = vmul.f32 %v735_v9, %v523_v3 }
 0x32f   : > { %v703_v29 = vadd.f32 %v702_v26, %v697_v23  ;;  %v747_v26 = vstv %s1074_s16  ;;  %v509_v31 = vmul.f32 %v508_v19, %v1492_v62  ;;  %v1541_v62 = vmul.f32 %v1424_v49, %v1494_v63  ;;  %s1280_s16 = smov 112  }
 0x331   : > { %v709_v34 = vadd.f32 %v708_v30, %v703_v29  ;;  %v518_v29 = vrot.slane %v1470_v58, %v1403_v17 }
 0x333   : > { %v715_v39 = vadd.f32 %v714_v35, %v709_v34 }
 0x335   : > { %v721_v48 = vadd.f32 %v720_v44, %v715_v39  ;;  %v759_v44 = vstv %s1078_s23  ;;  %s1282_s23 = smov 120  }
 0x337   : > { %v726_v56 = vadd.f32 %v725_v52, %v721_v48  ;;  %v765_v48 = vstv %s1080_s25  ;;  %v772_v52 = vrot.slane %v1541_v62, %v1400_v16  ;;  %s213_s25 = sand.u32 1, %s1247_s19  }
 0x36d   : > { %v415_v37 = vpop.permute.xlu1 %414 }
 0x36e   : > { %v416_v38 = vmul.f32 %v1397_v15, %v415_v37  ;;  %v519_v37 = vmul.f32 %v518_v29, %v513_v32  ;;  %v538_v32 = vrot.slane %v1470_v58, %v1413_v25 }
 0x370   : > { %v428_v41 = vrot.slane %v416_v38, %v1400_v16  ;;  %v437_v42 = vrot.slane %v416_v38, %v1403_v17  ;;  %v447_v43 = vrot.slane %v416_v38, %v1406_v18  ;;  %v457_v47 = vrot.slane %v416_v38, %v1413_v25 }
 0x371   : > { %v467_v15 = vrot.slane %v416_v38, %v1503_v14  ;;  %v477_v55 = vrot.slane %v416_v38, %v1507_v22  ;;  %v497_v7 = vrot.slane %v416_v38, %v1516_v33 }
 0x372   : > { %v429_v45 = vmul.f32 %v428_v41, %v423_v4  ;;  %v438_v46 = vmul.f32 %v437_v42, %v432_v59  ;;  %v448_v51 = vmul.f32 %v447_v43, %v442_v60  ;;  %v458_v54 = vmul.f32 %v457_v47, %v452_v2 }
 0x373   : > { %v468_v4 = vmul.f32 %v467_v15, %v462_v24  ;;  %v487_v59 = vrot.slane %v416_v38, %v1511_v28  ;;  %v478_v6 = vmul.f32 %v477_v55, %v1488_v61  ;;  %v732_v2 = vadd.f32 %v731_v0, %v726_v56 }
 0x374   : > { %v439_v50 = vadd.f32 %v438_v46, %v429_v45  ;;  %v498_v24 = vmul.f32 %v497_v7, %v492_v40  ;;  %v753_v40 = vstv %s1076_s17  ;;  %v548_v56 = vrot.slane %v1470_v58, %v1503_v14  ;;  %s1281_s17 = smov 88  }
 0x375   : > { %v488_v13 = vmul.f32 %v487_v59, %v1490_v5  ;;  %v738_v27 = vadd.f32 %v737_v20, %v732_v2  ;;  %v528_v5 = vrot.slane %v1470_v58, %v1406_v18  ;;  %v755_v43 = vmul.f32 %v753_v40, %v553_v36 }
 0x376   : > { %v449_v53 = vadd.f32 %v448_v51, %v439_v50 }
 0x377   : > { %v529_v11 = vmul.f32 %v528_v5, %v523_v3  ;;  %v778_v3 = vrot.slane %v1541_v62, %v1403_v17  ;;  %v796_v5 = vrot.slane %v1541_v62, %v1503_v14 }
 0x378   : > { %v459_v57 = vadd.f32 %v458_v54, %v449_v53  ;;  %v584_v54 = vpop.permute.xlu0 %583 }
 0x379   : > { %v773_v0 = vmul.f32 %v772_v52, %v584_v54 }
 0x37a   : > { %v469_v60 = vadd.f32 %v468_v4, %v459_v57  ;;  %v533_v8 = vpop.permute.xlu1 %532  ;;  %v558_v57 = vrot.slane %v1470_v58, %v1507_v22 }
 0x37b   : > { %v743_v21 = vmul.f32 %v741_v10, %v533_v8  ;;  %v539_v51 = vmul.f32 %v538_v32, %v533_v8 }
 0x37c   : > { %v479_v12 = vadd.f32 %v478_v6, %v469_v60  ;;  %v559_v8 = vmul.f32 %v558_v57, %v553_v36  ;;  %v604_v2 = vpop.permute.xlu0 %603 }
 0x37d   : > { %v744_v35 = vadd.f32 %v743_v21, %v738_v27  ;;  %v578_v27 = vrot.slane %v1470_v58, %v1516_v33 }
 0x37e   : > { %v489_v23 = vadd.f32 %v488_v13, %v479_v12  ;;  %v568_v12 = vrot.slane %v1470_v58, %v1511_v28  ;;  %v784_v13 = vrot.slane %v1541_v62, %v1406_v18 }
 0x37f   : > { %v543_v61 = vpop.permute.xlu1 %542 }
 0x380   : > { %v499_v30 = vadd.f32 %v498_v24, %v489_v23  ;;  %v749_v34 = vmul.f32 %v747_v26, %v543_v61  ;;  %v549_v4 = vmul.f32 %v548_v56, %v543_v61  ;;  %v785_v21 = vmul.f32 %v784_v13, %v604_v2  ;;  %v634_v40 = vpop.permute.xlu0 %633 }
 0x381   : > { %v790_v23 = vrot.slane %v1541_v62, %v1413_v25 }
 0x382   : > { %v510_v38 = vadd.f32 %v509_v31, %v499_v30  ;;  %v750_v39 = vadd.f32 %v749_v34, %v744_v35 }
 0x384   : > { %v520_v41 = vadd.f32 %v519_v37, %v510_v38  ;;  %v563_v42 = vpop.permute.xlu1 %562  ;;  %v756_v45 = vadd.f32 %v755_v43, %v750_v39 }
 0x385   : > { %v761_v46 = vmul.f32 %v759_v44, %v563_v42  ;;  %v569_v20 = vmul.f32 %v568_v12, %v563_v42 }
 0x386   : > { %v530_v47 = vadd.f32 %v529_v11, %v520_v41 }
 0x387   : > { %v762_v53 = vadd.f32 %v761_v46, %v756_v45 }
 0x388   : > { %v540_v55 = vadd.f32 %v539_v51, %v530_v47 }
 0x389   : > { %v573_v50 = vpop.permute.xlu1 %572 }
 0x38a   : > { %v767_v15 = vmul.f32 %v765_v48, %v573_v50  ;;  %v550_v60 = vadd.f32 %v549_v4, %v540_v55  ;;  %v579_v31 = vmul.f32 %v578_v27, %v573_v50 }
 0x38c   : > { %v768_v1 = vadd.f32 %v767_v15, %v762_v53  ;;  %v560_v10 = vadd.f32 %v559_v8, %v550_v60 }
 0x38e   : > { %v594_v59 = vpop.permute.xlu1 %593  ;;  %v774_v6 = vadd.f32 %v773_v0, %v768_v1  ;;  %v570_v26 = vadd.f32 %v569_v20, %v560_v10 }
 0x38f   : > { %v779_v7 = vmul.f32 %v778_v3, %v594_v59 }
 0x390   : > { %v580_v37 = vadd.f32 %v579_v31, %v570_v26 }
 0x391   : > { %v780_v19 = vadd.f32 %v779_v7, %v774_v6 }
 0x393   : > { %v614_v9 = vpop.permute.xlu1 %613  ;;  %v786_v29 = vadd.f32 %v785_v21, %v780_v19 }
 0x394   : > { %v791_v30 = vmul.f32 %v790_v23, %v614_v9 }
 0x396   : > { %v792_v41 = vadd.f32 %v791_v30, %v786_v29 }
 0x397   : > { %v418_v24 = vpop.permute.xlu1 %417 }
 0x398   : > { %v419_v61 = vmul.f32 %v1424_v49, %v418_v24  ;;  %v802_v49 = vrot.slane %v1541_v62, %v1507_v22 }
 0x39a   : > { %v589_v34 = vrot.slane %v419_v61, %v1400_v16  ;;  %v599_v35 = vrot.slane %v419_v61, %v1403_v17  ;;  %v609_v39 = vrot.slane %v419_v61, %v1406_v18  ;;  %v619_v16 = vrot.slane %v419_v61, %v1413_v25 }
 0x39b   : > { %v624_v36 = vpop.permute.xlu1 %623  ;;  %v808_v17 = vrot.slane %v1541_v62, %v1511_v28  ;;  %v803_v45 = vmul.f32 %v802_v49, %v634_v40  ;;  %v629_v32 = vrot.slane %v419_v61, %v1503_v14  ;;  %v639_v48 = vrot.slane %v419_v61, %v1507_v22  ;;  %v665_v14 = vpop.permute.xlu0 %664 }
 0x39c   : > { %v590_v38 = vmul.f32 %v589_v34, %v584_v54  ;;  %v797_v42 = vmul.f32 %v796_v5, %v624_v36  ;;  %v600_v44 = vmul.f32 %v599_v35, %v594_v59  ;;  %v610_v47 = vmul.f32 %v609_v39, %v604_v2 }
 0x39d   : > { %v620_v51 = vmul.f32 %v619_v16, %v614_v9  ;;  %v630_v54 = vmul.f32 %v629_v32, %v624_v36  ;;  %v814_v25 = vrot.slane %v1541_v62, %v1516_v33  ;;  %v649_v55 = vrot.slane %v419_v61, %v1511_v28 }
 0x39e   : > { %v591_v43 = vadd.f32 %v590_v38, %v580_v37  ;;  %v798_v11 = vadd.f32 %v797_v42, %v792_v41  ;;  %v640_v57 = vmul.f32 %v639_v48, %v634_v40  ;;  %v659_v22 = vrot.slane %v419_v61, %v1516_v33 }
 0x3a0   : > { %v601_v46 = vadd.f32 %v600_v44, %v591_v43  ;;  %v644_v18 = vpop.permute.xlu1 %643  ;;  %v804_v15 = vadd.f32 %v803_v45, %v798_v11 }
 0x3a1   : > { %v809_v52 = vmul.f32 %v808_v17, %v644_v18  ;;  %v650_v3 = vmul.f32 %v649_v55, %v644_v18 }
 0x3a2   : > { %v611_v50 = vadd.f32 %v610_v47, %v601_v46 }
 0x3a3   : > { %v810_v4 = vadd.f32 %v809_v52, %v804_v15 }
 0x3a4   : > { %v621_v53 = vadd.f32 %v620_v51, %v611_v50 }
 0x3a5   : > { %v654_v56 = vpop.permute.xlu1 %653 }
 0x3a6   : > { %v631_v1 = vadd.f32 %v630_v54, %v621_v53  ;;  %v815_v59 = vmul.f32 %v814_v25, %v654_v56  ;;  %v660_v7 = vmul.f32 %v659_v22, %v654_v56 }
 0x3a8   : > { %v641_v0 = vadd.f32 %v640_v57, %v631_v1  ;;  %v816_v60 = vadd.f32 %v815_v59, %v810_v4 }
 0x3aa   : > { %v651_v6 = vadd.f32 %v650_v3, %v641_v0  ;;  %v817_v8 = vadd.f32 %v816_v60, %v665_v14 }
 0x3ac   : > { %v821_v9 = vsel %vm820_vm2, %v817_v8, 0.0  ;;  %v661_v62 = vadd.f32 %v660_v7, %v651_v6 }
 0x3ad   : > { %822 = vadd.xlane.f32.xlu1 %v821_v9 }
 0x3ae   : > { %v667_v28 = vadd.f32 %v665_v14, %v661_v62 }
 0x3b0   : > { %818 = vadd.xlane.f32.xlu0 %v667_v28 }
 0x436   : > { %v823_v2 = vpop.xlane.xlu1 %822 }
 0x437   : > { %v824_v10 = vmul.f32 48.0, %v823_v2 }
 0x439   : > { %v819_v12 = vpop.xlane.xlu0 %818 }
 0x43a   : > { %v825_v13 = vadd.f32 %v824_v10, %v819_v12 }
 0x43c   : > { %v826_v19 = vmul.f32 0.001953125, %v825_v13 }
 0x43e   : > { %v827_v20 = vsub.f32 %v667_v28, %v826_v19  ;;  %v828_v21 = vsub.f32 %v817_v8, %v826_v19 }
 0x440   : > { %v829_v23 = vmul.f32 %v827_v20, %v827_v20  ;;  %v832_v33 = vmul.f32 %v828_v21, %v828_v21 }
 0x442   : > { %830 = vadd.xlane.f32.xlu0 %v829_v23  ;;  %v833_v24 = vsel %vm820_vm2, %v832_v33, 0.0 }
 0x443   : > { %834 = vadd.xlane.f32.xlu1 %v833_v24 }
 0x4cb   : > { %v831_v61 = vpop.xlane.xlu0 %830 }
 0x4cc   : > { %v835_v26 = vpop.xlane.xlu1 %834 }
 0x4cd   : > { %v836_v27 = vmul.f32 48.0, %v835_v26 }
 0x4cf   : > { %v837_v29 = vadd.f32 %v836_v27, %v831_v61 }
 0x4d1   : > { %v838_v30 = vmul.f32 0.001953125, %v837_v29 }
 0x4d3   : > { %v839_v31 = vadd.f32 1e-05, %v838_v30 }
 0x4d5   : > { %1189 = vrsqrt.f32 %v839_v31 }
 0x4e2   : > { %v1190_v34 = vpop.eup %1189 }
 0x4e3   : > { %v848_v35 = vmul.f32 %v1190_v34, %v828_v21  ;;  %v841_v36 = vmul.f32 %v1190_v34, %v827_v20 }
 0x4e5   : > { %v850_v5 = vmul.f32 0.70710677, %v848_v35  ;;  %v843_v37 = vmul.f32 0.70710677, %v841_v36  ;;  %v849_v39 = vmul.f32 0.5, %v848_v35  ;;  %v842_v44 = vmul.f32 0.5, %v841_v36 }
 0x4e7   : > { %1191 = verf.f32 %v850_v5 }
 0x4e8   : > { %1193 = verf.f32 %v843_v37 }
 0x4f4   : > { %v1192_v38 = vpop.eup %1191 }
 0x4f5   : > { %v852_v40 = vadd.f32 1.0, %v1192_v38  ;;  %v1194_v49 = vpop.eup %1193 }
 0x4f6   : > { %v845_v43 = vadd.f32 1.0, %v1194_v49 }
 0x4f7   : > { %v853_v41 = vmul.f32 %v852_v40, %v849_v39 }
 0x4f8   : > { %v846_v16 = vmul.f32 %v845_v43, %v842_v44 }
 0x4f9   : > { %v854_v42 = vadd.f32 %v853_v41, %v1494_v63 }
 0x4fa   : > { %v847_v11 = vadd.f32 %v846_v16, %v1470_v58 }
 0x4fb   : > { %859 = vrot.lane.b32.xlu0 %v854_v42, %s1268_s26  ;;  %856 = vrot.lane.b32.xlu1 %v854_v42, %s1269_s30 }
 0x4ff   : > { %868 = vrot.lane.b32.xlu0 %v854_v42, %s1270_s6  ;;  %862 = vrot.lane.b32.xlu1 %v854_v42, %s1271_s7 }
 0x503   : > { %874 = vrot.lane.b32.xlu0 %v854_v42, %s1272_s8  ;;  %865 = vrot.lane.b32.xlu1 %v854_v42, %s1273_s9 }
 0x507   : > { %871 = vrot.lane.b32.xlu1 %v854_v42, %s1274_s10  ;;  %935 = vrot.lane.b32.xlu0 %v847_v11, %s1275_s11 }
 0x50b   : > { %891 = vrot.lane.b32.xlu0 %v847_v11, %s1269_s30  ;;  %914 = vrot.lane.b32.xlu1 %v847_v11, %s1276_s12  ;;  %s1064_s30 = sshll.u32 %s1335_s22, 9  ;;  %s978_s22 = scalar_lea.sflag [#allocation3], %s213_s25 }
 0x50c   : > { %s1283_s12 = smov [#allocation2]  }
 0x50f   : > { %938 = vrot.lane.b32.xlu0 %v847_v11, %s1277_s13  ;;  %956 = vrot.lane.b32.xlu1 %v847_v11, %s1273_s9  ;;  %s1199_s13 = sshll.u32 %s1283_s12, 4  ;;  %s1200_s13 = int_to_ptr.vmem [resolvable:$false] %s1199_s13 }
 0x513   : > { %894 = vrot.lane.b32.xlu0 %v847_v11, %s1268_s26  ;;  %917 = vrot.lane.b32.xlu1 %v847_v11, %s1278_s14  ;;  %s1055_s26 = sshll.u32 %s213_s25, 5  ;;  %s1201_s14 = scalar_lea.vmem %s1200_s13, 1024 }
 0x517   : > { %941 = vrot.lane.b32.xlu0 %v847_v11, %s1279_s15  ;;  %959 = vrot.lane.b32.xlu1 %v847_v11, %s1270_s6  ;;  %s215_s6 = scalar_lea.vmem [#allocation2], %s1055_s26 }
 0x51b   : > { %897 = vrot.lane.b32.xlu0 %v847_v11, %s1271_s7  ;;  %920 = vrot.lane.b32.xlu1 %v847_v11, %s1280_s16  ;;  %s992_s7 = sshll.u32 %s215_s6, 4  ;;  %s1626_s7 = int_to_ptr.vmem [resolvable:$true] %s992_s7 }
 0x51c   : > { %p1202_p0 = scmp.lt.s32.totalorder %s1626_s7, %s1200_s13 }
 0x51f   : > { %944 = vrot.lane.b32.xlu0 %v847_v11, %s1281_s17  ;;  %962 = vrot.lane.b32.xlu1 %v847_v11, %s1274_s10  ;;  %s1624_s10 = scalar_lea.hbm %s1670_s5, %s1064_s30 }
 0x523   : > { %923 = vrot.lane.b32.xlu1 %v847_v11, %s1282_s23 }
 0x527   : > { %965 = vrot.lane.b32.xlu1 %v847_v11, %s1272_s8 }
 0x56d   : > { %v860_v58 = vpop.permute.xlu0 %859  ;;  %v857_v63 = vpop.permute.xlu1 %856 }
 0x56e   : > { %v877_v46 = vsel %vm820_vm2, %v854_v42, %v857_v63  ;;  %v904_v55 = vsel %vm820_vm2, %v847_v11, %v857_v63 }
 0x56f   : > { %v879_v47 = vsel %vm878_vm3, %v877_v46, %v860_v58 }
 0x571   : > { %v869_v17 = vpop.permute.xlu0 %868  ;;  %v863_v45 = vpop.permute.xlu1 %862 }
 0x572   : > { %v881_v18 = vsel %vm880_vm4, %v879_v47, %v863_v45 }
 0x575   : > { %v875_v32 = vpop.permute.xlu0 %874  ;;  %v866_v48 = vpop.permute.xlu1 %865 }
 0x576   : > { %v883_v50 = vsel %vm882_vm5, %v881_v18, %v866_v48 }
 0x577   : > { %v885_v51 = vsel %vm884_vm6, %v883_v50, %v869_v17 }
 0x579   : > { %v872_v15 = vpop.permute.xlu1 %871  ;;  %v936_v52 = vpop.permute.xlu0 %935 }
 0x57a   : > { %v887_v53 = vsel %vm886_vm7, %v885_v51, %v872_v15  ;;  %v947_v4 = vsel %vm820_vm2, %v936_v52, %v857_v63 }
 0x57b   : > { %v889_v54 = vsel %vm888_vm8, %v887_v53, %v875_v32 }
 0x57c   : > { %901 = vrot.lane.b32.xlu0 %v889_v54, %s1275_s11  ;;  %s1195_s11 = scalar_lea.vmem %s1626_s7, 512 }
 0x57d   : > { %v892_v25 = vpop.permute.xlu0 %891  ;;  %v915_v56 = vpop.permute.xlu1 %914  ;;  %p1196_p11 = scmp.ne.s32.totalorder %s1626_s7, %s1195_s11  ;;  %p1203_p1 = scmp.lt.s32.totalorder %s1201_s14, %s1195_s11 }
 0x57e   : > { %v905_v1 = vsel %vm878_vm3, %v904_v55, %v892_v25  ;;  %v926_v22 = vsel %vm820_vm2, %v915_v56, %v857_v63 }
 0x57f   : > { %v906_v57 = vsel %vm880_vm4, %v905_v1, %v863_v45  ;;  %p1197_p12 = pnand %p1196_p11, %p1352_p5  ;;  %p1204_p2 = por %p1203_p1, %p1202_p0 }
 0x581   : > { %v939_v59 = vpop.permute.xlu0 %938  ;;  %v957_v14 = vpop.permute.xlu1 %956  ;;  %p1198_p13 = pneg %p1197_p12 }
 0x582   : > { %v948_v0 = vsel %vm878_vm3, %v947_v4, %v939_v59  ;;  %v968_v28 = vsel %vm820_vm2, %v957_v14, %v857_v63 }
 0x583   : > { %v949_v3 = vsel %vm880_vm4, %v948_v0, %v863_v45  ;;  %p1205_p3 = pnand %p1204_p2, %p1198_p13 }
 0x585   : > { %v895_v60 = vpop.permute.xlu0 %894  ;;  %v918_v6 = vpop.permute.xlu1 %917 }
 0x586   : > { %v907_v7 = vsel %vm882_vm5, %v906_v57, %v895_v60  ;;  %v927_v8 = vsel %vm878_vm3, %v926_v22, %v918_v6 }
 0x587   : > { %v908_v9 = vsel %vm884_vm6, %v907_v7, %v869_v17  ;;  %v928_v62 = vsel %vm880_vm4, %v927_v8, %v863_v45 }
 0x589   : > { %v942_v2 = vpop.permute.xlu0 %941  ;;  %v960_v10 = vpop.permute.xlu1 %959 }
 0x58a   : > { %v950_v12 = vsel %vm882_vm5, %v949_v3, %v942_v2  ;;  %v969_v13 = vsel %vm878_vm3, %v968_v28, %v960_v10 }
 0x58b   : > { %v951_v19 = vsel %vm884_vm6, %v950_v12, %v869_v17  ;;  %v970_v20 = vsel %vm880_vm4, %v969_v13, %v863_v45 }
 0x58d   : > { %v898_v21 = vpop.permute.xlu0 %897  ;;  %v921_v23 = vpop.permute.xlu1 %920 }
 0x58e   : > { %v909_v33 = vsel %vm886_vm7, %v908_v9, %v898_v21  ;;  %v929_v24 = vsel %vm882_vm5, %v928_v62, %v921_v23 }
 0x58f   : > { %v910_v26 = vsel %vm888_vm8, %v909_v33, %v875_v32  ;;  %v930_v27 = vsel %vm884_vm6, %v929_v24, %v869_v17 }
 0x591   : > { %v945_v61 = vpop.permute.xlu0 %944  ;;  %v963_v29 = vpop.permute.xlu1 %962 }
 0x592   : > { %v952_v30 = vsel %vm886_vm7, %v951_v19, %v945_v61  ;;  %v971_v31 = vsel %vm882_vm5, %v970_v20, %v963_v29 }
 0x593   : > { %v953_v34 = vsel %vm888_vm8, %v952_v30, %v875_v32  ;;  %v972_v35 = vsel %vm884_vm6, %v971_v31, %v869_v17 }
 0x595   : > { %v924_v5 = vpop.permute.xlu1 %923 }
 0x596   : > { %v931_v36 = vsel %vm886_vm7, %v930_v27, %v924_v5 }
 0x597   : > { %v932_v37 = vsel %vm888_vm8, %v931_v36, %v875_v32 }
 0x599   : > { %v966_v38 = vpop.permute.xlu1 %965 }
 0x59a   : > { %v973_v39 = vsel %vm886_vm7, %v972_v35, %v966_v38 }
 0x59b   : > { %v974_v40 = vsel %vm888_vm8, %v973_v39, %v875_v32 }
 0x5ee   : > { %v902_v41 = vpop.permute.xlu0 %901 }
 0x5ef   : > { %v912_v42 = vsel %vm911_vm9, %v910_v26, %v902_v41  ;;  %v933_v49 = vsel %vm911_vm9, %v932_v37, %v902_v41  ;;  %v954_v43 = vsel %vm911_vm9, %v953_v34, %v902_v41  ;;  %v975_v44 = vsel %vm911_vm9, %v974_v40, %v902_v41 }
 0x5f0   : > { %913 = vst [vmem:[%s215_s6] sm:$0xff] %v912_v42  ;;  %934 = vst [vmem:[%s215_s6 + $0x8] sm:$0xff] %v933_v49 }
 0x5f1   : > { %955 = vst [vmem:[%s215_s6 + $0x10] sm:$0xff] %v954_v43  ;;  %976 = vst [vmem:[%s215_s6 + $0x18] sm:$0xff] %v975_v44 }
 0x5f2   : > { %1208 = shalt.err (!%p1205_p3)
}
 0x5f3   : > { %s1209_s15 = scalar_lea.hbm %s1624_s10, 512  ;;  %s1213_s23 = scalar_lea.hbm %s1670_s5, 1024 }
 0x5f4   : > { %p1210_p4 = scmp.ne.s32.totalorder %s1624_s10, %s1209_s15  ;;  %p1214_p9 = scmp.lt.s32.totalorder %s1624_s10, %s1670_s5 }
 0x5f5   : > { %p1215_p10 = scmp.lt.s32.totalorder %s1213_s23, %s1209_s15 }
 0x5f6   : > { %p1211_p7 = pnand %p1210_p4, %p1352_p5 }
 0x5f7   : > { %p1216_p11 = por %p1215_p10, %p1214_p9 }
 0x5f8   : > { %p1212_p8 = pneg %p1211_p7 }
 0x5fa   : > { %p1217_p12 = pnand %p1216_p11, %p1212_p8 }
 0x5fc   : > { %1220 = shalt.err (!%p1217_p12)
}
 0x5fd   : > { %1081 = dma.vmem_to_hbm [thread:$0]  (%p1352_p5), %s1626_s7, 512, %s1624_s10, %s978_s22  }
 0x5fe PF: > { %p1087_p13 = scmp.ge.s32.totalorder %s1255_s21, 2  ;;  %s1004_s30 = sand.u32 1, %s1243_s18  }
 0x5ff   : > { %s1005_s6 = scalar_lea.sflag [#allocation3], %s1004_s30 }
 0x600   : > { %p1084_p0 = pnand %p1087_p13, %p1356_p6 }
 0x602   : > { %p1085_p1 = pneg %p1084_p0 }
 0x604   : > { %1238 = dma.done.wait (%p1085_p1), %s1005_s6, 512  }
 0x605   : > { %1240 = vsyncadd (%p1085_p1), %s1005_s6, 4294966784  ;;  %p15_p2 = scmp.ge.s32.totalorder %s1339_s24, 4   ;;  %s1673_s18 = smov %s1247_s19 }
 0x606   : > { %s1674_s19 = smov %s1251_s20  ;;  %s1675_s20 = smov %s1350_s27 }
 0x607   : > { %s1676_s21 = smov %s1339_s24  ;;  %17 = sbr.rel (!%p15_p2) target bundleno = 3 (0x3), region = 75 }
 0x60c   :  { %1010 = vsyncpa [#allocation3], 1 }
 0x60d   :  { %1012 = vsyncpa [#allocation3 + $0x1], 1 }

</bundles_post_ra>
